<compile_context>
chip_gen: v5e
topology: v5e:2x2
jax: 0.10.0
libtpu: 0.0.40
codegen_flags: <defaults>
</compile_context>

<pallas_src>
from functools import partial

import jax
import jax.numpy as jnp
from jax import lax
from jax.experimental import pallas as pl
from jax.experimental.pallas import tpu as pltpu

POLY_ORDER = 3
LN_EPS = 1e-5


def _round_up(n, m):
    return ((n + m - 1) // m) * m


def _silu(x, approx):
    # silu(x) = x / (1 + exp(-x)); exp and the (approx) reciprocal both execute on
    # the EUP slot, leaving the VALU slot (the binding slot for tiny matmuls) free.
    return x * pl.reciprocal(1.0 + jnp.exp(-x), approx=approx)


def polynomial_kernel(scal_ref, x_ref, w_ref, b0_ref, gamma_ref, beta_ref,
                      o_ref, a_ref, *, poly_order, in_features, exact):
    approx = not exact
    scale = scal_ref[0]                           # SMEM scalars (global min/max affine)
    offset = scal_ref[1]
    mxu_dtype = a_ref.dtype                       # bf16 fast path / f32 check path

    x = x_ref[...].astype(jnp.float32)            # elementwise math stays f32 (v5e-safe)

    # --- Fused MXU operand A = [silu(x), x_norm, x_norm^2, ..., x_norm^P] ---------
    # Streamed directly into a single VMEM scratch in mxu_dtype (early cast keeps
    # f32 vreg pressure low); replaces P+1 separate tiny-K matmuls with one dot.
    a_ref[:, pl.ds(0, in_features)] = _silu(x, approx).astype(mxu_dtype)
    x_norm = x * scale + offset                   # globally min/max-normalized input
    x_pow = x_norm
    for p in range(poly_order):
        a_ref[:, pl.ds((p + 1) * in_features, in_features)] = x_pow.astype(mxu_dtype)
        if p + 1 < poly_order:
            x_pow = x_pow * x_norm

    # --- Single MXU matmul, f32 accumulation; p=0 monomial folded into b0 ---------
    acc = jnp.dot(
        a_ref[...], w_ref[...],
        preferred_element_type=jnp.float32,
        precision=lax.Precision.HIGHEST if exact else lax.Precision.DEFAULT)
    acc = acc + b0_ref[...]                       # (TB, Fout)

    # --- LayerNorm over out_features (no feature padding -> plain reductions) -----
    inv_n = 1.0 / acc.shape[-1]
    mean = jnp.sum(acc, axis=-1, keepdims=True) * inv_n
    diff = acc - mean
    var = jnp.sum(diff * diff, axis=-1, keepdims=True) * inv_n
    y = diff * lax.rsqrt(var + LN_EPS)
    y = y * gamma_ref[...] + beta_ref[...]

    # --- Final base activation, direct (unpadded) store ----------------------------
    o_ref[...] = _silu(y, approx).astype(o_ref.dtype)


def preprocess_params(base_weight, poly_weight, gamma, beta,
                      poly_order=POLY_ORDER, mxu_dtype=jnp.bfloat16):
    """One-time parameter re-layout (NOT a per-forward cost)."""
    out_features, in_features = base_weight.shape
    pw = poly_weight.reshape(out_features, in_features, poly_order + 1)

    # p = 0 monomial column is all-ones -> fold into a bias row.
    bias0 = pw[:, :, 0].sum(axis=1).reshape(1, out_features).astype(jnp.float32)

    # Fused weight: row blocks [base | poly p=1 | ... | poly p=P], each (Fin, Fout),
    # matching the kernel's fused operand A -> ONE ((P+1)*Fin, Fout) matmul.
    w_all = jnp.concatenate(
        [base_weight.T] + [pw[:, :, p].T for p in range(1, poly_order + 1)],
        axis=0).astype(mxu_dtype)                                  # ((P+1)*Fin, Fout)

    gamma_r = gamma.reshape(1, out_features).astype(jnp.float32)
    beta_r = beta.reshape(1, out_features).astype(jnp.float32)
    return dict(w_all=w_all, bias0=bias0, gamma=gamma_r, beta=beta_r,
                in_features=in_features, out_features=out_features,
                poly_order=poly_order, mxu_dtype=mxu_dtype)


def polynomial_layer_forward(x, params, *, block_batch=1024):
    B, Fin = x.shape
    assert Fin == params["in_features"]
    Fout = params["out_features"]
    P = params["poly_order"]
    mxu_dtype = params["mxu_dtype"]
    exact = jnp.dtype(mxu_dtype) == jnp.dtype(jnp.float32)
    w_all, bias0 = params["w_all"], params["bias0"]
    gamma_r, beta_r = params["gamma"], params["beta"]
    k_all = w_all.shape[0]                                         # (P+1)*Fin

    # Global min/max normalization must be a GLOBAL reduction -> hoisted out of the
    # kernel. Reduce in x's native dtype (no full-array cast); under jit XLA fuses
    # the two sibling reductions into a single pass over x.
    x_min = jnp.min(x).astype(jnp.float32)
    x_max = jnp.max(x).astype(jnp.float32)
    denom = x_max - x_min                  # TODO(synk): no max==min guard (as in PyTorch ref)
    scale = 2.0 / denom
    offset = -2.0 * x_min / denom - 1.0
    scalars = jnp.stack([scale, offset]).astype(jnp.float32)       # (2,) -> SMEM

    # Generation-aware VMEM ceiling (64 MiB/TC on v7x, 128 MiB on v5e/v6e).
    try:
        vmem_cap = int(getattr(pltpu.get_tpu_info(), "vmem_capacity_bytes", 64 << 20))
    except Exception:
        vmem_cap = 64 << 20
    vmem_ceiling = (vmem_cap * 13) // 16            # leave compiler-scratch headroom

    w_itemsize = jnp.dtype(mxu_dtype).itemsize
    resident = (w_all.size * w_itemsize
                + (bias0.size + gamma_r.size + beta_r.size) * 4)   # single-buffered

    def _tile_bytes(tb):
        io = 2 * tb * (Fin + Fout) * x.dtype.itemsize              # double-buffered x/out
        scratch = tb * k_all * w_itemsize                          # fused operand A
        temps = 8 * tb * max(Fin, Fout) * 4                        # f32 temporaries (estimate)
        return io + scratch + temps

    # Batch tile: as large as the VMEM budget allows, but keep >= 2 grid steps so the
    # "parallel" batch axis can be sharded across v7x's two TensorCores.
    if B <= 8:
        tb = B
    else:
        tb = min(block_batch, _round_up(pl.cdiv(B, 2), 8))
        while tb > 8 and resident + _tile_bytes(tb) + (4 << 20) > vmem_ceiling:
            tb = _round_up(tb // 2, 8)
    grid = (pl.cdiv(B, tb),)

    vmem_limit = int(max(32 << 20,
                         min(vmem_ceiling, resident + _tile_bytes(tb) + (4 << 20))))

    def resident_spec(shape):
        # Constant index_map -> weight stays put; single-buffer it (no extra DMA,
        # halves the resident-weight VMEM footprint — important under v7x's 64 MiB).
        return pl.BlockSpec(shape, lambda i: (0,) * len(shape),
                            pipeline_mode=pl.Buffered(buffer_count=1))

    kernel = partial(polynomial_kernel, poly_order=P, in_features=Fin, exact=exact)
    out = pl.pallas_call(
        kernel,
        out_shape=jax.ShapeDtypeStruct((B, Fout), x.dtype),
        grid=grid,
        in_specs=[
            pl.BlockSpec(memory_space=pltpu.MemorySpace.SMEM),     # (scale, offset)
            pl.BlockSpec((tb, Fin), lambda i: (i, 0)),             # x batch tile (pipelined)
            resident_spec((k_all, Fout)),                          # fused weight (resident)
            resident_spec((1, Fout)),                              # folded p=0 bias
            resident_spec((1, Fout)),                              # LayerNorm gamma
            resident_spec((1, Fout)),                              # LayerNorm beta
        ],
        out_specs=pl.BlockSpec((tb, Fout), lambda i: (i, 0)),      # direct, unpadded store
        scratch_shapes=[pltpu.VMEM((tb, k_all), mxu_dtype)],       # fused MXU operand A
        compiler_params=pltpu.CompilerParams(
            dimension_semantics=("parallel",),                     # shard batch across TCs (v7x)
            vmem_limit_bytes=vmem_limit,
        ),
    )(scalars, x, w_all, bias0, gamma_r, beta_r)
    return out


def polynomial_layer(x, base_weight, poly_weight, gamma, beta,
                     poly_order=POLY_ORDER, mxu_dtype=jnp.bfloat16, block_batch=1024):
    params = preprocess_params(base_weight, poly_weight, gamma, beta,
                               poly_order=poly_order, mxu_dtype=mxu_dtype)
    return polynomial_layer_forward(x, params, block_batch=block_batch)


def _reference(x, base_weight, poly_weight, gamma, beta, poly_order=POLY_ORDER):
    """Pure-JAX reference mirroring the PyTorch forward exactly (f32)."""
    silu = jax.nn.silu
    base_out = silu(x) @ base_weight.T
    x_norm = 2.0 * (x - x.min()) / (x.max() - x.min()) - 1.0
    powers = jnp.arange(poly_order + 1, dtype=x.dtype)
    basis = x_norm[:, :, None] ** powers                           # (B, Fin, P+1)
    basis = basis.reshape(x.shape[0], -1)                          # interleaved [i*(P+1)+p]
    poly_out = basis @ poly_weight.T
    y = base_out + poly_out
    mean = jnp.mean(y, axis=-1, keepdims=True)
    var = jnp.mean((y - mean) ** 2, axis=-1, keepdims=True)
    y = (y - mean) / jnp.sqrt(var + LN_EPS) * gamma + beta
    return silu(y)


if __name__ == "__main__":
    # Make the pure-JAX reference matmuls run at f32 accuracy on TPU.
    jax.config.update("jax_default_matmul_precision", "highest")

    B, Fin, Fout = 256, 16, 32       # B=256 -> two 128-row tiles (pipelined, megacore-shardable)

    key = jax.random.PRNGKey(0)
    kx, kb, kp = jax.random.split(key, 3)
    x = jax.random.normal(kx, (B, Fin), dtype=jnp.float32)
    base_weight = jax.random.normal(kb, (Fout, Fin), dtype=jnp.float32)
    poly_weight = jax.random.normal(kp, (Fout, Fin * (POLY_ORDER + 1)), dtype=jnp.float32)
    gamma = jnp.ones((Fout,), dtype=jnp.float32)
    beta = jnp.zeros((Fout,), dtype=jnp.float32)

    ref = _reference(x, base_weight, poly_weight, gamma, beta)

    # Accuracy check: f32 MXU operands + HIGHEST precision + exact reciprocal.
    out_f32 = polynomial_layer(x, base_weight, poly_weight, gamma, beta,
                               mxu_dtype=jnp.float32)
    out_f32 = jax.block_until_ready(out_f32)
    assert out_f32.shape == (B, Fout)
    assert jnp.allclose(out_f32, ref, atol=5e-3, rtol=5e-3), "f32 kernel mismatch vs reference"

    # Fast path: bf16 MXU operands, f32 accumulation / elementwise (looser tolerance).
    out_bf16 = polynomial_layer(x, base_weight, poly_weight, gamma, beta,
                                mxu_dtype=jnp.bfloat16)
    out_bf16 = jax.block_until_ready(out_bf16)
    assert out_bf16.shape == (B, Fout)
    assert jnp.allclose(out_bf16, ref, atol=5e-2, rtol=5e-2), "bf16 kernel mismatch vs reference"

    print("KERNEL_OK")
</pallas_src>

<mosaic_0001>
module attributes {stable_mosaic.version = 11 : i64} {
  func.func @polynomial_kernel(%arg0: i32, %arg1: memref<2xf32, #tpu.memory_space<smem>>, %arg2: memref<128x16xf32, #tpu.memory_space<vmem>>, %arg3: memref<64x32xf32, #tpu.memory_space<vmem>>, %arg4: memref<1x32xf32, #tpu.memory_space<vmem>>, %arg5: memref<1x32xf32, #tpu.memory_space<vmem>>, %arg6: memref<1x32xf32, #tpu.memory_space<vmem>>, %arg7: memref<128x32xf32, #tpu.memory_space<vmem>>, %arg8: memref<128x64xf32, #tpu.memory_space<vmem>>) attributes {dimension_semantics = [#tpu.dimension_semantics<parallel>], iteration_bounds = array<i64: 2>, scalar_prefetch = 0 : i64, scratch_operands = 1 : i64, tpu.core_type = #tpu.core_type<tc>, window_params = [{transform_indices = @transform_0, window_bounds = array<i64: 2>}, {transform_indices = @transform_1, window_bounds = array<i64: 128, 16>}, {pipeline_mode = #tpu.pipeline_mode<synchronous>, transform_indices = @transform_2, window_bounds = array<i64: 64, 32>}, {pipeline_mode = #tpu.pipeline_mode<synchronous>, transform_indices = @transform_3, window_bounds = array<i64: 1, 32>}, {pipeline_mode = #tpu.pipeline_mode<synchronous>, transform_indices = @transform_4, window_bounds = array<i64: 1, 32>}, {pipeline_mode = #tpu.pipeline_mode<synchronous>, transform_indices = @transform_5, window_bounds = array<i64: 1, 32>}, {transform_indices = @transform_6, window_bounds = array<i64: 128, 32>}]} {
    %c0 = arith.constant 0 : index
    %0 = memref.load %arg1[%c0] : memref<2xf32, #tpu.memory_space<smem>>
    %c1 = arith.constant 1 : index
    %1 = memref.load %arg1[%c1] : memref<2xf32, #tpu.memory_space<smem>>
    %c0_0 = arith.constant 0 : index
    %c0_1 = arith.constant 0 : index
    %2 = vector.load %arg2[%c0_0, %c0_1] : memref<128x16xf32, #tpu.memory_space<vmem>>, vector<128x16xf32>
    %cst = arith.constant 0.000000e+00 : f32
    %3 = vector.broadcast %cst : f32 to vector<128x16xf32>
    %4 = arith.subf %3, %2 : vector<128x16xf32>
    %5 = math.exp %4 : vector<128x16xf32>
    %cst_2 = arith.constant 1.000000e+00 : f32
    %6 = vector.broadcast %cst_2 : f32 to vector<128x16xf32>
    %7 = arith.addf %6, %5 : vector<128x16xf32>
    %8 = tpu.reciprocal %7 : vector<128x16xf32> -> vector<128x16xf32>
    %9 = arith.mulf %2, %8 : vector<128x16xf32>
    %c0_3 = arith.constant 0 : index
    %c0_4 = arith.constant 0 : index
    %10 = vector.load %arg8[%c0_3, %c0_4] : memref<128x64xf32, #tpu.memory_space<vmem>>, vector<128x16xf32>
    tpu.vector_store %arg8[%c0_3, %c0_4], %9 {strides = array<i32>} : memref<128x64xf32, #tpu.memory_space<vmem>>, vector<128x16xf32>,
    %11 = vector.broadcast %0 : f32 to vector<128x16xf32>
    %12 = arith.mulf %2, %11 : vector<128x16xf32>
    %13 = vector.broadcast %1 : f32 to vector<128x16xf32>
    %14 = arith.addf %12, %13 : vector<128x16xf32>
    %c0_5 = arith.constant 0 : index
    %c16 = arith.constant 16 : index
    %15 = vector.load %arg8[%c0_5, %c16] : memref<128x64xf32, #tpu.memory_space<vmem>>, vector<128x16xf32>
    tpu.vector_store %arg8[%c0_5, %c16], %14 {strides = array<i32>} : memref<128x64xf32, #tpu.memory_space<vmem>>, vector<128x16xf32>,
    %16 = arith.mulf %14, %14 : vector<128x16xf32>
    %c0_6 = arith.constant 0 : index
    %c32 = arith.constant 32 : index
    %17 = vector.load %arg8[%c0_6, %c32] : memref<128x64xf32, #tpu.memory_space<vmem>>, vector<128x16xf32>
    tpu.vector_store %arg8[%c0_6, %c32], %16 {strides = array<i32>} : memref<128x64xf32, #tpu.memory_space<vmem>>, vector<128x16xf32>,
    %18 = arith.mulf %16, %14 : vector<128x16xf32>
    %c0_7 = arith.constant 0 : index
    %c48 = arith.constant 48 : index
    %19 = vector.load %arg8[%c0_7, %c48] : memref<128x64xf32, #tpu.memory_space<vmem>>, vector<128x16xf32>
    tpu.vector_store %arg8[%c0_7, %c48], %18 {strides = array<i32>} : memref<128x64xf32, #tpu.memory_space<vmem>>, vector<128x16xf32>,
    %c0_8 = arith.constant 0 : index
    %c0_9 = arith.constant 0 : index
    %20 = vector.load %arg8[%c0_8, %c0_9] : memref<128x64xf32, #tpu.memory_space<vmem>>, vector<128x64xf32>
    %c0_10 = arith.constant 0 : index
    %c0_11 = arith.constant 0 : index
    %21 = vector.load %arg3[%c0_10, %c0_11] : memref<64x32xf32, #tpu.memory_space<vmem>>, vector<64x32xf32>
    %cst_12 = arith.constant dense<0.000000e+00> : vector<128x32xf32>
    %22 = tpu.matmul %20, %21, %cst_12 {dimension_numbers = #tpu.dot_dimension_numbers<[1], [0], [0], [1], [0, 0, 1, 1], [], []>, precision = #tpu.contract_precision<fp32>} : vector<128x64xf32>, vector<64x32xf32>, vector<128x32xf32> -> vector<128x32xf32>
    %c0_13 = arith.constant 0 : index
    %c0_14 = arith.constant 0 : index
    %23 = vector.load %arg4[%c0_13, %c0_14] : memref<1x32xf32, #tpu.memory_space<vmem>>, vector<1x32xf32>
    %24 = vector.broadcast %23 : vector<1x32xf32> to vector<128x32xf32>
    %25 = arith.addf %22, %24 : vector<128x32xf32>
    %cst_15 = arith.constant dense<0.000000e+00> : vector<128xf32>
    %26 = vector.multi_reduction <add>, %25, %cst_15 [1] : vector<128x32xf32> to vector<128xf32>
    %27 = vector.shape_cast %26 : vector<128xf32> to vector<128x1xf32>
    %cst_16 = arith.constant 3.125000e-02 : f32
    %28 = vector.broadcast %cst_16 : f32 to vector<128x1xf32>
    %29 = arith.mulf %27, %28 : vector<128x1xf32>
    %30 = vector.broadcast %29 : vector<128x1xf32> to vector<128x32xf32>
    %31 = arith.subf %25, %30 : vector<128x32xf32>
    %32 = arith.mulf %31, %31 : vector<128x32xf32>
    %cst_17 = arith.constant dense<0.000000e+00> : vector<128xf32>
    %33 = vector.multi_reduction <add>, %32, %cst_17 [1] : vector<128x32xf32> to vector<128xf32>
    %34 = vector.shape_cast %33 : vector<128xf32> to vector<128x1xf32>
    %cst_18 = arith.constant 3.125000e-02 : f32
    %35 = vector.broadcast %cst_18 : f32 to vector<128x1xf32>
    %36 = arith.mulf %34, %35 : vector<128x1xf32>
    %cst_19 = arith.constant 9.99999974E-6 : f32
    %37 = vector.broadcast %cst_19 : f32 to vector<128x1xf32>
    %38 = arith.addf %36, %37 : vector<128x1xf32>
    %39 = math.rsqrt %38 : vector<128x1xf32>
    %40 = vector.broadcast %39 : vector<128x1xf32> to vector<128x32xf32>
    %41 = arith.mulf %31, %40 : vector<128x32xf32>
    %c0_20 = arith.constant 0 : index
    %c0_21 = arith.constant 0 : index
    %42 = vector.load %arg5[%c0_20, %c0_21] : memref<1x32xf32, #tpu.memory_space<vmem>>, vector<1x32xf32>
    %43 = vector.broadcast %42 : vector<1x32xf32> to vector<128x32xf32>
    %44 = arith.mulf %41, %43 : vector<128x32xf32>
    %c0_22 = arith.constant 0 : index
    %c0_23 = arith.constant 0 : index
    %45 = vector.load %arg6[%c0_22, %c0_23] : memref<1x32xf32, #tpu.memory_space<vmem>>, vector<1x32xf32>
    %46 = vector.broadcast %45 : vector<1x32xf32> to vector<128x32xf32>
    %47 = arith.addf %44, %46 : vector<128x32xf32>
    %cst_24 = arith.constant 0.000000e+00 : f32
    %48 = vector.broadcast %cst_24 : f32 to vector<128x32xf32>
    %49 = arith.subf %48, %47 : vector<128x32xf32>
    %50 = math.exp %49 : vector<128x32xf32>
    %cst_25 = arith.constant 1.000000e+00 : f32
    %51 = vector.broadcast %cst_25 : f32 to vector<128x32xf32>
    %52 = arith.addf %51, %50 : vector<128x32xf32>
    %53 = tpu.reciprocal %52 : vector<128x32xf32> -> vector<128x32xf32>
    %54 = arith.mulf %47, %53 : vector<128x32xf32>
    %c0_26 = arith.constant 0 : index
    %c0_27 = arith.constant 0 : index
    %55 = vector.load %arg7[%c0_26, %c0_27] : memref<128x32xf32, #tpu.memory_space<vmem>>, vector<128x32xf32>
    tpu.vector_store %arg7[%c0_26, %c0_27], %54 {strides = array<i32>} : memref<128x32xf32, #tpu.memory_space<vmem>>, vector<128x32xf32>,
    return
  }
  func.func @transform_0(%arg0: i32) -> i32 {
    %c0_i32 = arith.constant 0 : i32
    %c0_i32_0 = arith.constant 0 : i32
    return %c0_i32 : i32
  }
  func.func @transform_1(%arg0: i32) -> (i32, i32) {
    %c0_i32 = arith.constant 0 : i32
    %c0_i32_0 = arith.constant 0 : i32
    return %arg0, %c0_i32 : i32, i32
  }
  func.func @transform_2(%arg0: i32) -> (i32, i32) {
    %c0_i32 = arith.constant 0 : i32
    %c0_i32_0 = arith.constant 0 : i32
    %c0_i32_1 = arith.constant 0 : i32
    return %c0_i32, %c0_i32_0 : i32, i32
  }
  func.func @transform_3(%arg0: i32) -> (i32, i32) {
    %c0_i32 = arith.constant 0 : i32
    %c0_i32_0 = arith.constant 0 : i32
    %c0_i32_1 = arith.constant 0 : i32
    return %c0_i32, %c0_i32_0 : i32, i32
  }
  func.func @transform_4(%arg0: i32) -> (i32, i32) {
    %c0_i32 = arith.constant 0 : i32
    %c0_i32_0 = arith.constant 0 : i32
    %c0_i32_1 = arith.constant 0 : i32
    return %c0_i32, %c0_i32_0 : i32, i32
  }
  func.func @transform_5(%arg0: i32) -> (i32, i32) {
    %c0_i32 = arith.constant 0 : i32
    %c0_i32_0 = arith.constant 0 : i32
    %c0_i32_1 = arith.constant 0 : i32
    return %c0_i32, %c0_i32_0 : i32, i32
  }
  func.func @transform_6(%arg0: i32) -> (i32, i32) {
    %c0_i32 = arith.constant 0 : i32
    %c0_i32_0 = arith.constant 0 : i32
    return %arg0, %c0_i32 : i32, i32
  }
}

</mosaic_0001>

<bundles_post_ra>
// kernel: tpu_custom_call.1
= control target key start
LH: loop header
LB: loop body
LE: loop exit
PB: predicated region body
PF: predicated region fallthrough
CT: control target
= control target key end

     0   :  { %11 = vsyncpa [#allocation4], 0  ;;  %s2761_s21 = smov 0   ;;  %s4381_s0 = inlined_call_operand.vmem [shape: f32[2], index: 0, kind: input, shape index: {}]   ;;  %s4382_s1 = inlined_call_operand.vmem [shape: f32[256,16], index: 1, kind: input, shape index: {}]   ;;  %s4383_s2 = inlined_call_operand.vmem [shape: f32[64,32], index: 2, kind: input, shape index: {}]   ;;  %s4384_s3 = inlined_call_operand.vmem [shape: f32[1,32], index: 3, kind: input, shape index: {}]   ;;  %s4385_s4 = inlined_call_operand.vmem [shape: f32[1,32], index: 4, kind: input, shape index: {}]   ;;  %s4386_s5 = inlined_call_operand.vmem [shape: f32[1,32], index: 5, kind: input, shape index: {}]   ;;  %s4387_s6 = inlined_call_operand.vmem [shape: f32[256,32], index: 6, kind: output, shape index: {}]  }
   0x1 LB: > { %s2477_s22 = sadd.s32 4294967295, %s2720_s21   ;;  %p2479_p0 = scmp.ge.s32.totalorder %s2720_s21, 1  ;;  %s2720_s21 = sphi %s2761_s21, %s17_s21  }
   0x2   : > { %p179_p1 = scmp.lt.s32.totalorder %s2720_s21, 3  ;;  %s191_s25 = sshll.u32 %s4381_s0, 4  ;;  %s192_s25 = int_to_ptr.vmem [resolvable:$true] %s191_s25 }
   0x3   : > { %p2515_p3 = scmp.eq.s32.totalorder %s2477_s22, 0  ;;  %s2722_s26 = smov [#allocation3]  }
   0x4   : > { %p180_p2 = pnand %p2479_p0, %p179_p1 }
   0x6   : > { %p2511_p4 = pneg %p180_p2  ;;  %225 = sbr.rel (%p180_p2) target bundleno = 842 (0x34a), region = 44 }
   0x8   : > { %p2512_p5 = pnand %p2515_p3, %p2511_p4 }
   0xa   : > { %2514 = dma.vmem_to_smem (!%p2512_p5), %s192_s25, 16, %s2722_s26, [#allocation4]  }
   0xb   : > { %2715 = dma.done.wait (%p2515_p3), [#allocation4], 16  }
   0xc   : > { %2717 = vsyncadd (%p2515_p3), [#allocation4], 4294967280 }
   0xd   : > { %232 = sfence }
   0xe   : > { %s2484_s27 = sshll.u32 %s2477_s22, 4  ;;  %s269_s28 = sld [smem:[#allocation3]]  ;;  %vm591_vm11 = vcmask 130048   ;;  %vm706_vm13 = vcmask 261248  }
   0xf   : > { %p258_p6 = scmp.lt.s32.totalorder %s2484_s27, 31  ;;  %s2488_s29 = sld [smem:[#allocation3 + $0x1]] }
  0x10   : > { %s2723_s10 = smov 16   ;;  %s2724_s11 = smov 32  }
  0x11   : > { %s4427_s27 = smov (!%p258_p6, %s2484_s27), 31  ;;  %s2725_s12 = smov 48  }
  0x12   : > { %s2485_s30 = sshll.u32 %s4427_s27, 3 }
  0x13   : > { %s2780_s9 = scalar_lea.vmem %s4382_s1, %s2485_s30  ;;  %s4037_s16 = scalar_lea.vmem %s4387_s6, %s2485_s30 }
  0x14   : > { %v2782_v0 = vstv %s269_s28  ;;  %v2785_v1 = vld [vmem:[%s2780_s9 + $0x48] sm:$0xff]  ;;  %v2790_v3 = vld [vmem:[%s2780_s9 + $0x40] sm:$0xff]  ;;  %v2810_v14 = vld [vmem:[%s2780_s9 + $0x50] sm:$0xff] }
  0x15   : > { %v2787_v2 = vstv %s2488_s29  ;;  %v2793_v4 = vld [vmem:[%s2780_s9] sm:$0xff]  ;;  %v618_v5 = vmul.f32 %v2782_v0, %v2785_v1  ;;  %v617_v6 = vmul.f32 %v2782_v0, %v2790_v3  ;;  %v619_v17 = vmul.f32 %v2782_v0, %v2810_v14  ;;  %v2819_v20 = vld [vmem:[%s2780_s9 + $0x8] sm:$0xff]  ;;  %v2828_v24 = vld [vmem:[%s2780_s9 + $0x58] sm:$0xff] }
  0x16   : > { %v609_v7 = vmul.f32 %v2782_v0, %v2793_v4  ;;  %v610_v21 = vmul.f32 %v2782_v0, %v2819_v20  ;;  %v620_v27 = vmul.f32 %v2782_v0, %v2828_v24  ;;  %v2837_v30 = vld [vmem:[%s2780_s9 + $0x10] sm:$0xff]  ;;  %v296_v34 = vsub.f32 0.0, %v2785_v1  ;;  %v2848_v36 = vld [vmem:[%s2780_s9 + $0x60] sm:$0xff]  ;;  %v2858_v46 = vld [vmem:[%s2780_s9 + $0x18] sm:$0xff] }
  0x17   : > { %v635_v8 = vadd.f32 %v2787_v2, %v618_v5  ;;  %v634_v9 = vadd.f32 %v2787_v2, %v617_v6  ;;  %v636_v19 = vadd.f32 %v2787_v2, %v619_v17  ;;  %v611_v31 = vmul.f32 %v2782_v0, %v2837_v30  ;;  %v2869_v54 = vld [vmem:[%s2780_s9 + $0x68] sm:$0xff]  ;;  %v2880_v63 = vld [vmem:[%s2780_s9 + $0x20] sm:$0xff] }
  0x18   : > { %v626_v10 = vadd.f32 %v2787_v2, %v609_v7  ;;  %v627_v23 = vadd.f32 %v2787_v2, %v610_v21  ;;  %v637_v29 = vadd.f32 %v2787_v2, %v620_v27  ;;  %v295_v35 = vsub.f32 0.0, %v2790_v3 }
  0x19   : > { %676 = vrot.lane.b32.xlu1 %v635_v8, %s2723_s10  ;;  %674 = vrot.lane.b32.xlu0 %v634_v9, %s2723_s10  ;;  %v731_v11 = vmul.f32 %v634_v9, %v634_v9  ;;  %v732_v13 = vmul.f32 %v635_v8, %v635_v8  ;;  %v733_v22 = vmul.f32 %v636_v19, %v636_v19  ;;  %v287_v37 = vsub.f32 0.0, %v2793_v4 }
  0x1a   : > { %658 = vrot.lane.b32.xlu2 %v626_v10, %s2723_s10  ;;  %v723_v12 = vmul.f32 %v626_v10, %v626_v10  ;;  %v724_v25 = vmul.f32 %v627_v23, %v627_v23  ;;  %v734_v32 = vmul.f32 %v637_v29, %v637_v29  ;;  %v628_v33 = vadd.f32 %v2787_v2, %v611_v31 }
  0x1b   : > { %v829_v15 = vmul.f32 %v732_v13, %v635_v8  ;;  %v828_v16 = vmul.f32 %v731_v11, %v634_v9  ;;  %v830_v26 = vmul.f32 %v733_v22, %v636_v19  ;;  %v321_v39 = vmul.f32 1.442695, %v296_v34 }
  0x1c   : > { %v820_v18 = vmul.f32 %v723_v12, %v626_v10  ;;  %v821_v28 = vmul.f32 %v724_v25, %v627_v23  ;;  %v725_v38 = vmul.f32 %v628_v33, %v628_v33  ;;  %v831_v40 = vmul.f32 %v734_v32, %v637_v29 }
  0x1d   : > { %v621_v41 = vmul.f32 %v2782_v0, %v2848_v36  ;;  %v319_v42 = vmul.f32 1.442695, %v295_v35  ;;  %v303_v44 = vmul.f32 1.442695, %v287_v37  ;;  %2532 = vpow2.f32 %v321_v39 }
  0x1e   : > { %v822_v43 = vmul.f32 %v725_v38, %v628_v33  ;;  %v612_v47 = vmul.f32 %v2782_v0, %v2858_v46  ;;  %v297_v56 = vsub.f32 0.0, %v2810_v14  ;;  %v622_v60 = vmul.f32 %v2782_v0, %v2869_v54 }
  0x1f   : > { %v638_v45 = vadd.f32 %v2787_v2, %v621_v41  ;;  %2534 = vpow2.f32 %v319_v42  ;;  %v288_v5 = vsub.f32 0.0, %v2819_v20  ;;  %v298_v7 = vsub.f32 0.0, %v2828_v24 }
  0x20   : > { %2536 = vpow2.f32 %v303_v44  ;;  %v629_v51 = vadd.f32 %v2787_v2, %v612_v47  ;;  %v323_v62 = vmul.f32 1.442695, %v297_v56  ;;  %v639_v6 = vadd.f32 %v2787_v2, %v622_v60 }
  0x21   : > { %771 = vrot.lane.b32.xlu0 %v731_v11, %s2724_s11  ;;  %755 = vrot.lane.b32.xlu1 %v723_v12, %s2724_s11  ;;  %v735_v48 = vmul.f32 %v638_v45, %v638_v45  ;;  %v613_v8 = vmul.f32 %v2782_v0, %v2880_v63  ;;  %v289_v10 = vsub.f32 0.0, %v2837_v30  ;;  %v305_v12 = vmul.f32 1.442695, %v288_v5 }
  0x22   : > { %773 = vrot.lane.b32.xlu2 %v732_v13, %s2724_s11  ;;  %v726_v58 = vmul.f32 %v629_v51, %v629_v51  ;;  %v736_v13 = vmul.f32 %v639_v6, %v639_v6 }
  0x23   : > { %v2533_v49 = vpop.eup %2532  ;;  %v832_v59 = vmul.f32 %v735_v48, %v638_v45  ;;  %v630_v17 = vadd.f32 %v2787_v2, %v613_v8 }
  0x24   : > { %v2866_v53 = vadd.f32 1.0, %v2533_v49  ;;  %v823_v61 = vmul.f32 %v726_v58, %v629_v51  ;;  %v833_v35 = vmul.f32 %v736_v13, %v639_v6 }
  0x25   : > { %v2535_v50 = vpop.eup %2534 }
  0x26   : > { %v2537_v52 = vpop.eup %2536  ;;  %v2872_v55 = vadd.f32 1.0, %v2535_v50  ;;  %2538 = vrcp.f32 %v2866_v53  ;;  %vm482_vm3 = vweird.f32 %v2866_v53  ;;  %v486_v42 = vand.u32 2147483647, %v2866_v53 }
  0x27   : > { %v335_v57 = vadd.f32 1.0, %v2537_v52  ;;  %v2932_v52 = vld [vmem:[%s2780_s9 + $0x28] sm:$0xff]  ;;  %v488_v56 = vand.u32 2147483648, %v2866_v53 }
  0x28   : > { %2540 = vrcp.f32 %v2872_v55  ;;  %v474_v49 = vand.u32 2147483648, %v2872_v55  ;;  %vm468_vm7 = vweird.f32 %v2872_v55  ;;  %vm487_vm8 = vcmp.eq.f32.partialorder %v486_v42, 8.507059e+37 }
  0x29   : > { %870 = vrot.lane.b32.xlu0 %v829_v15, %s2725_s12  ;;  %868 = vrot.lane.b32.xlu1 %v828_v16, %s2725_s12  ;;  %2542 = vrcp.f32 %v335_v57  ;;  %v325_v16 = vmul.f32 1.442695, %v298_v7  ;;  %vm356_vm0 = vweird.f32 %v335_v57  ;;  %v362_v27 = vand.u32 2147483648, %v335_v57 }
  0x2a   : > { %852 = vrot.lane.b32.xlu2 %v820_v18, %s2725_s12  ;;  %2544 = vpow2.f32 %v323_v62  ;;  %v307_v18 = vmul.f32 1.442695, %v289_v10  ;;  %v472_v5 = vand.u32 2147483647, %v2872_v55  ;;  %v614_v7 = vmul.f32 %v2782_v0, %v2932_v52 }
  0x2b   : > { %2546 = vpow2.f32 %v305_v12  ;;  %v363_v41 = vor.u32 1.1754944e-38, %v362_v27  ;;  %v938_v27 = vld [vmem:[%s4383_s2 + $0x28] sm:$0xff] }
  0x2c   : > { %v2890_v9 = vpop.eup %2538  ;;  %2548 = vpow2.f32 %v325_v16  ;;  %vm473_vm12 = vcmp.eq.f32.partialorder %v472_v5, 8.507059e+37 }
  0x2d   : > { %2550 = vpow2.f32 %v307_v18  ;;  %vm483_vm4 = vweird.f32 %v2890_v9 }
  0x2e   : > { %v2893_v11 = vpop.eup %2540  ;;  %vm2923_vm6 = vmor %vm482_vm3, %vm483_vm4 }
  0x2f   : > { %v2543_v15 = vpop.eup %2542  ;;  %v464_v21 = vmul.f32 %v2893_v11, %v2872_v55  ;;  %vm469_vm9 = vweird.f32 %v2893_v11 }
  0x30   : > { %vm357_vm1 = vweird.f32 %v2543_v15  ;;  %vm470_vm10 = vmor %vm468_vm7, %vm469_vm9 }
  0x31   : > { %678 = vrot.lane.b32.xlu0 %v636_v19, %s2723_s10  ;;  %775 = vrot.lane.b32.xlu1 %v733_v22, %s2724_s11  ;;  %v478_v19 = vmul.f32 %v2890_v9, %v2866_v53  ;;  %v2545_v22 = vpop.eup %2544  ;;  %v465_v34 = vsub.f32 1.0, %v464_v21  ;;  %vm2911_vm2 = vmor %vm356_vm0, %vm357_vm1  ;;  %v631_v21 = vadd.f32 %v2787_v2, %v614_v7 }
  0x32   : > { %660 = vrot.lane.b32.xlu2 %v627_v23, %s2723_s10  ;;  %v2903_v23 = vld [vmem:[%s2780_s9 + $0x70] sm:$0xff] }
  0x33   : > { %v479_v31 = vsub.f32 1.0, %v478_v19 }
  0x35   : > { %v480_v39 = vmul.f32 %v2890_v9, %v479_v31 }
  0x37   : > { %v481_v47 = vadd.f32 %v2890_v9, %v480_v39 }
  0x39   : > { %872 = vrot.lane.b32.xlu0 %v830_v26, %s2725_s12  ;;  %757 = vrot.lane.b32.xlu1 %v724_v25, %s2724_s11  ;;  %v352_v25 = vmul.f32 %v2543_v15, %v335_v57  ;;  %v727_v26 = vmul.f32 %v630_v17, %v630_v17 }
  0x3a   : > { %854 = vrot.lane.b32.xlu2 %v821_v28, %s2725_s12 }
  0x3b   : > { %v353_v28 = vsub.f32 1.0, %v352_v25  ;;  %v824_v37 = vmul.f32 %v727_v26, %v630_v17 }
  0x41   : > { %680 = vrot.lane.b32.xlu0 %v637_v29, %s2723_s10  ;;  %777 = vrot.lane.b32.xlu1 %v734_v32, %s2724_s11  ;;  %v360_v29 = vand.u32 2147483647, %v335_v57  ;;  %v2906_v32 = vadd.f32 1.0, %v2545_v22  ;;  %v466_v57 = vmul.f32 %v2893_v11, %v465_v34  ;;  %v728_v34 = vmul.f32 %v631_v21, %v631_v21 }
  0x42   : > { %662 = vrot.lane.b32.xlu2 %v628_v33, %s2723_s10  ;;  %v623_v33 = vmul.f32 %v2782_v0, %v2903_v23 }
  0x43   : > { %vm2918_vm5 = vcmp.eq.f32.partialorder %v360_v29, 8.507059e+37  ;;  %v467_v62 = vadd.f32 %v2893_v11, %v466_v57  ;;  %2552 = vrcp.f32 %v2906_v32  ;;  %vm496_vm14 = vweird.f32 %v2906_v32 }
  0x45   : > { %v471_v12 = vsel %vm470_vm10, %v2893_v11, %v467_v62  ;;  %v940_v11 = vld [vmem:[%s4383_s2 + $0x38] sm:$0xff] }
  0x46   : > { %v2969_v18 = vand.u32 4294901760, %v940_v11 }
  0x48   : > { %1003 = vmatpush.msra.mxu0 %v2969_v18  ;;  %2491 = vmatpush.msra.mxu2 %v2969_v18 }
  0x49   : > { %874 = vrot.lane.b32.xlu0 %v831_v40, %s2725_s12  ;;  %759 = vrot.lane.b32.xlu1 %v725_v38, %s2724_s11  ;;  %v354_v38 = vmul.f32 %v2543_v15, %v353_v28  ;;  %v290_v28 = vsub.f32 0.0, %v2858_v46 }
  0x4a   : > { %856 = vrot.lane.b32.xlu2 %v822_v43, %s2725_s12  ;;  %v2547_v43 = vpop.eup %2546 }
  0x4b   : > { %v355_v44 = vadd.f32 %v2543_v15, %v354_v38  ;;  %v2549_v50 = vpop.eup %2548 }
  0x4c   : > { %v2551_v60 = vpop.eup %2550 }
  0x4d   : > { %v2986_v25 = vadd.f32 1.0, %v2551_v60  ;;  %v3008_v38 = vpop.eup %2552 }
  0x4e   : > { %v492_v62 = vmul.f32 %v3008_v38, %v2906_v32  ;;  %vm497_vm15 = vweird.f32 %v3008_v38 }
  0x4f   : > { %vm3108_vm0 = vmor %vm496_vm14, %vm497_vm15 }
  0x51   : > { %682 = vrot.lane.b32.xlu0 %v638_v45, %s2723_s10  ;;  %779 = vrot.lane.b32.xlu1 %v735_v48, %s2724_s11 }
  0x52   : > { %664 = vrot.lane.b32.xlu2 %v629_v51, %s2723_s10  ;;  %v2929_v51 = vadd.f32 %v2787_v2, %v623_v33  ;;  %v3001_v33 = vand.u32 4294901760, %v938_v27 }
  0x59   : > { %876 = vrot.lane.b32.xlu0 %v832_v59, %s2725_s12  ;;  %761 = vrot.lane.b32.xlu1 %v726_v58, %s2724_s11  ;;  %v359_v58 = vsel %vm2911_vm2, %v2543_v15, %v355_v44  ;;  %v485_v59 = vsel %vm2923_vm6, %v2890_v9, %v481_v47  ;;  %v475_v9 = vor.u32 1.1754944e-38, %v474_v49  ;;  %v737_v15 = vmul.f32 %v2929_v51, %v2929_v51  ;;  %v936_v47 = vld [vmem:[%s4383_s2 + $0x18] sm:$0xff] }
  0x5a   : > { %858 = vrot.lane.b32.xlu2 %v823_v61, %s2725_s12  ;;  %v364_v53 = vsel %vm2918_vm5, %v363_v41, %v359_v58  ;;  %v489_v61 = vor.u32 1.1754944e-38, %v488_v56  ;;  %v3021_v44 = vsub.f32 %v938_v27, %v3001_v33  ;;  %v309_v49 = vmul.f32 1.442695, %v290_v28 }
  0x5b   : > { %v575_v8 = vmul.f32 %v364_v53, %v2793_v4  ;;  %v476_v16 = vsel %vm473_vm12, %v475_v9, %v471_v12  ;;  %v834_v39 = vmul.f32 %v737_v15, %v2929_v51  ;;  %v3037_v57 = vand.u32 4294901760, %v936_v47 }
  0x5c   : > { %v490_v10 = vsel %vm487_vm8, %v489_v61, %v485_v59  ;;  %v583_v4 = vmul.f32 %v476_v16, %v2790_v3  ;;  %v2981_v3 = vsub.f32 %v940_v11, %v2969_v18  ;;  %v300_v59 = vsub.f32 0.0, %v2869_v54  ;;  %v935_v61 = vld [vmem:[%s4383_s2 + $0x10] sm:$0xff]  ;;  %v934_v16 = vld [vmem:[%s4383_s2 + $0x8] sm:$0xff] }
  0x5d   : > { %592 = vst.msk [vmem:[#allocation2] sm:$0xff] %vm591_vm11, %v575_v8  ;;  %v584_v55 = vmul.f32 %v490_v10, %v2785_v1  ;;  %v939_v1 = vld [vmem:[%s4383_s2 + $0x30] sm:$0xff]  ;;  %v1169_v60 = vand.u32 4294901760, %v3021_v44  ;;  %v3059_v7 = vsub.f32 %v936_v47, %v3037_v57  ;;  %v3061_v8 = vand.u32 4294901760, %v935_v61 }
  0x5e   : > { %600 = vst.msk [vmem:[#allocation2 + $0x40] sm:$0xff] %vm591_vm11, %v583_v4  ;;  %v2983_v22 = vand.u32 4294901760, %v939_v1  ;;  %v1157_v29 = vand.u32 4294901760, %v2981_v3  ;;  %vm803_vm6 = vcmask 392448   ;;  %vm384_vm12 = vweird.f32 %v2986_v25 }
  0x5f   : > { %601 = vst.msk [vmem:[#allocation2 + $0x48] sm:$0xff] %vm591_vm11, %v584_v55  ;;  %v1170_v12 = vsub.f32 %v3021_v44, %v1169_v60  ;;  %v493_v55 = vsub.f32 1.0, %v492_v62  ;;  %v1181_v4 = vand.u32 4294901760, %v3059_v7  ;;  %v3078_v11 = vsub.f32 %v935_v61, %v3061_v8 }
  0x60   : > { %v2999_v31 = vsub.f32 %v939_v1, %v2983_v22  ;;  %1005 = vmatpush.msra.mxu0 %v2983_v22  ;;  %v1158_v41 = vsub.f32 %v2981_v3, %v1157_v29  ;;  %2492 = vmatpush.msra.mxu2 %v2983_v22  ;;  %v500_v61 = vand.u32 2147483647, %v2906_v32  ;;  %v502_v62 = vand.u32 2147483648, %v2906_v32 }
  0x61   : > { %684 = vrot.lane.b32.xlu0 %v639_v6, %s2723_s10  ;;  %781 = vrot.lane.b32.xlu1 %v736_v13, %s2724_s11  ;;  %v299_v6 = vsub.f32 0.0, %v2848_v36  ;;  %v2955_v13 = vadd.f32 1.0, %v2547_v43  ;;  %v825_v43 = vmul.f32 %v728_v34, %v631_v21  ;;  %v1171_v27 = vand.u32 4294901760, %v1170_v12 }
  0x62   : > { %666 = vrot.lane.b32.xlu2 %v630_v17, %s2723_s10  ;;  %v2961_v17 = vadd.f32 1.0, %v2549_v50  ;;  %v1163_v42 = vand.u32 4294901760, %v2999_v31  ;;  %1007 = vmatpush.msra.mxu0 %v3001_v33  ;;  %v3032_v50 = vld [vmem:[%s2780_s9 + $0x30] sm:$0xff]  ;;  %vm501_vm2 = vcmp.eq.f32.partialorder %v500_v61, 8.507059e+37 }
  0x63   : > { %v327_v19 = vmul.f32 1.442695, %v299_v6  ;;  %2554 = vrcp.f32 %v2955_v13  ;;  %2493 = vmatpush.msra.mxu2 %v3001_v33  ;;  %v615_v10 = vmul.f32 %v2782_v0, %v3032_v50  ;;  %vm370_vm1 = vweird.f32 %v2955_v13 }
  0x64   : > { %2556 = vrcp.f32 %v2961_v17  ;;  %v1164_v56 = vsub.f32 %v2999_v31, %v1163_v42  ;;  %vm510_vm7 = vweird.f32 %v2961_v17 }
  0x65   : > { %2558 = vpow2.f32 %v327_v19 }
  0x66   : > { %2560 = vrcp.f32 %v2986_v25  ;;  %v1165_v6 = vand.u32 4294901760, %v1164_v56 }
  0x67   : > { %2562 = vpow2.f32 %v309_v49 }
  0x69   : > { %878 = vrot.lane.b32.xlu0 %v833_v35, %s2725_s12  ;;  %763 = vrot.lane.b32.xlu1 %v727_v26, %s2724_s11  ;;  %v2989_v26 = vld [vmem:[%s2780_s9 + $0x78] sm:$0xff]  ;;  %v3029_v48 = vpop.eup %2554 }
  0x6a   : > { %860 = vrot.lane.b32.xlu2 %v824_v37, %s2725_s12  ;;  %v937_v37 = vld [vmem:[%s4383_s2 + $0x20] sm:$0xff]  ;;  %v624_v40 = vmul.f32 %v2782_v0, %v2989_v26  ;;  %v3040_v58 = vpop.eup %2556  ;;  %v366_v19 = vmul.f32 %v3029_v48, %v2955_v13  ;;  %vm371_vm3 = vweird.f32 %v3029_v48 }
  0x6b   : > { %v3024_v45 = vand.u32 4294901760, %v937_v37  ;;  %v3063_v9 = vpop.eup %2558  ;;  %vm3142_vm4 = vmor %vm370_vm1, %vm371_vm3  ;;  %vm511_vm8 = vweird.f32 %v3040_v58 }
  0x6c   : > { %v3056_v5 = vadd.f32 %v2787_v2, %v624_v40  ;;  %v4388_v40 = vand.u32 4294901760, %v3078_v11  ;;  %vm3210_vm9 = vmor %vm510_vm7, %vm511_vm8 }
  0x6d   : > { %v3045_v53 = vsub.f32 %v937_v37, %v3024_v45  ;;  %1009 = vmatpush.msra.mxu0 %v3024_v45  ;;  %2494 = vmatpush.msra.mxu2 %v3024_v45 }
  0x6e   : > { %v738_v37 = vmul.f32 %v3056_v5, %v3056_v5 }
  0x6f   : > { %1011 = vmatpush.msra.mxu0 %v3037_v57  ;;  %2495 = vmatpush.msra.mxu2 %v3037_v57 }
  0x71   : > { %686 = vrot.lane.b32.xlu0 %v2929_v51, %s2723_s10  ;;  %783 = vrot.lane.b32.xlu1 %v737_v15, %s2724_s11  ;;  %v1159_v51 = vand.u32 4294901760, %v1158_v41  ;;  %v1175_v15 = vand.u32 4294901760, %v3045_v53  ;;  %v632_v41 = vadd.f32 %v2787_v2, %v615_v10 }
  0x72   : > { %668 = vrot.lane.b32.xlu2 %v631_v21, %s2723_s10  ;;  %v3082_v21 = vpop.eup %2560  ;;  %1013 = vmatpush.msra.mxu0 %v3061_v8 }
  0x73   : > { %2499 = vmatpush.msra.mxu3 %v1159_v51  ;;  %1160 = vmatpush.msra.mxu1 %v1159_v51  ;;  %v1176_v28 = vsub.f32 %v3045_v53, %v1175_v15  ;;  %v1188_v51 = vsub.f32 %v3078_v11, %v4388_v40  ;;  %v2563_v32 = vpop.eup %2562  ;;  %vm385_vm14 = vweird.f32 %v3082_v21 }
  0x74   : > { %v659_v35 = vpop.permute.xlu2 %658  ;;  %2496 = vmatpush.msra.mxu2 %v3061_v8  ;;  %vm3231_vm15 = vmor %vm384_vm12, %vm385_vm14 }
  0x75   : > { %707 = vst.msk [vmem:[#allocation2] sm:$0xff] %vm706_vm13, %v659_v35  ;;  %2500 = vmatpush.msra.mxu3 %v1165_v6  ;;  %v3090_v35 = vand.u32 4294901760, %v934_v16  ;;  %1166 = vmatpush.msra.mxu1 %v1165_v6  ;;  %v3116_v6 = vld [vmem:[%s2780_s9 + $0x38] sm:$0xff] }
  0x76   : > { %v616_v56 = vmul.f32 %v2782_v0, %v3116_v6 }
  0x77   : > { %2501 = vmatpush.msra.mxu3 %v1171_v27  ;;  %1172 = vmatpush.msra.mxu1 %v1171_v27  ;;  %v3122_v12 = vsub.f32 %v934_v16, %v3090_v35  ;;  %v933_v27 = vld [vmem:[%s4383_s2] sm:$0xff] }
  0x78   : > { %1015 = vmatpush.msra.mxu0 %v3090_v35  ;;  %2497 = vmatpush.msra.mxu2 %v3090_v35 }
  0x79   : > { %880 = vrot.lane.b32.xlu0 %v834_v39, %s2725_s12  ;;  %765 = vrot.lane.b32.xlu1 %v728_v34, %s2724_s11  ;;  %v494_v34 = vmul.f32 %v3008_v38, %v493_v55  ;;  %v1182_v39 = vsub.f32 %v3059_v7, %v1181_v4  ;;  %v367_v55 = vsub.f32 1.0, %v366_v19  ;;  %v1193_v16 = vand.u32 4294901760, %v3122_v12 }
  0x7a   : > { %862 = vrot.lane.b32.xlu2 %v825_v43, %s2725_s12  ;;  %v1177_v43 = vand.u32 4294901760, %v1176_v28  ;;  %v1189_v28 = vand.u32 4294901760, %v1188_v51 }
  0x7b   : > { %v495_v47 = vadd.f32 %v3008_v38, %v494_v34  ;;  %v1183_v49 = vand.u32 4294901760, %v1182_v39  ;;  %v368_v19 = vmul.f32 %v3029_v48, %v367_v55  ;;  %v374_v34 = vand.u32 2147483647, %v2955_v13 }
  0x7c   : > { %v3084_v1 = vpop.permute.xlu2 %773  ;;  %2502 = vmatpush.msra.mxu3 %v1177_v43  ;;  %1178 = vmatpush.msra.mxu1 %v1177_v43  ;;  %v376_v39 = vand.u32 2147483648, %v2955_v13  ;;  %v3146_v43 = vand.u32 4294901760, %v933_v27  ;;  %v1194_v0 = vsub.f32 %v3122_v12, %v1193_v16  ;;  %v835_v13 = vmul.f32 %v738_v37, %v3056_v5 }
  0x7d   : > { %v499_v10 = vsel %vm3108_vm0, %v3008_v38, %v495_v47  ;;  %v503_v38 = vor.u32 1.1754944e-38, %v502_v62  ;;  %v729_v47 = vmul.f32 %v632_v41, %v632_v41  ;;  %vm375_vm5 = vcmp.eq.f32.partialorder %v374_v34, 8.507059e+37 }
  0x7e   : > { %2503 = vmatpush.msra.mxu3 %v1183_v49  ;;  %1184 = vmatpush.msra.mxu1 %v1183_v49  ;;  %v3158_v40 = vsub.f32 %v933_v27, %v3146_v43  ;;  %v3162_v49 = vadd.f32 1.0, %v3063_v9  ;;  %v329_v9 = vmul.f32 1.442695, %v300_v59  ;;  %vm900_vm0 = vcmask 523648  }
  0x7f   : > { %v504_v51 = vsel %vm501_vm2, %v503_v38, %v499_v10  ;;  %v369_v10 = vadd.f32 %v3029_v48, %v368_v19  ;;  %v377_v38 = vor.u32 1.1754944e-38, %v376_v39  ;;  %1017 = vmatpush.msra.mxu0 %v3146_v43  ;;  %2498 = vmatpush.msra.mxu2 %v3146_v43  ;;  %vm945_vm2 = vcmask 523264  }
  0x80   : > { %v585_v55 = vmul.f32 %v504_v51, %v2810_v14  ;;  %2504 = vmatpush.msra.mxu3 %v1189_v28  ;;  %v826_v14 = vmul.f32 %v729_v47, %v632_v41  ;;  %1190 = vmatpush.msra.mxu1 %v1189_v28  ;;  %v1195_v51 = vand.u32 4294901760, %v1194_v0  ;;  %v1199_v34 = vand.u32 4294901760, %v3158_v40 }
  0x81   : > { %688 = vrot.lane.b32.xlu0 %v3056_v5, %s2723_s10  ;;  %785 = vrot.lane.b32.xlu1 %v738_v37, %s2724_s11  ;;  %v373_v19 = vsel %vm3142_vm4, %v3029_v48, %v369_v10  ;;  %v291_v5 = vsub.f32 0.0, %v2880_v63  ;;  %v633_v37 = vadd.f32 %v2787_v2, %v616_v56  ;;  %v3180_v28 = vadd.f32 1.0, %v2563_v32 }
  0x82   : > { %670 = vrot.lane.b32.xlu2 %v632_v41, %s2723_s10  ;;  %602 = vst.msk [vmem:[#allocation2 + $0x50] sm:$0xff] %vm591_vm11, %v585_v55  ;;  %v378_v27 = vsel %vm375_vm5, %v377_v38, %v373_v19  ;;  %1278 = vmatpush.msrb.mxu2 %v2981_v3  ;;  %v506_v41 = vmul.f32 %v3040_v58, %v2961_v17  ;;  %2564 = vrcp.f32 %v3162_v49  ;;  %v514_v10 = vand.u32 2147483647, %v2961_v17 }
  0x83   : > { %1513 = vmatpush.msrb.mxu0 %v1157_v29  ;;  %2505 = vmatpush.msra.mxu3 %v1195_v51  ;;  %v576_v48 = vmul.f32 %v378_v27, %v2819_v20  ;;  %v1200_v2 = vsub.f32 %v3158_v40, %v1199_v34  ;;  %v380_v20 = vmul.f32 %v3082_v21, %v2986_v25  ;;  %v311_v29 = vmul.f32 1.442695, %v291_v5 }
  0x84   : > { %v3149_v62 = vpop.permute.xlu2 %852  ;;  %1196 = vmatpush.msra.mxu1 %v1195_v51  ;;  %v507_v3 = vsub.f32 1.0, %v506_v41  ;;  %1281 = vmatpush.msrb.mxu2 %v2999_v31  ;;  %v730_v39 = vmul.f32 %v633_v37, %v633_v37  ;;  %2566 = vpow2.f32 %v329_v9  ;;  %v516_v31 = vand.u32 2147483648, %v2961_v17 }
  0x85   : > { %593 = vst.msk [vmem:[#allocation2 + $0x8] sm:$0xff] %vm591_vm11, %v576_v48  ;;  %1517 = vmatpush.msrb.mxu0 %v1163_v42  ;;  %v381_v55 = vsub.f32 1.0, %v380_v20  ;;  %2568 = vrcp.f32 %v3180_v28  ;;  %vm515_vm10 = vcmp.eq.f32.partialorder %v514_v10, 8.507059e+37  ;;  %v388_v51 = vand.u32 2147483647, %v2986_v25 }
  0x86   : > { %v508_v61 = vmul.f32 %v3040_v58, %v507_v3  ;;  %1284 = vmatpush.msrb.mxu2 %v3021_v44  ;;  %v827_v0 = vmul.f32 %v730_v39, %v633_v37  ;;  %2570 = vpow2.f32 %v311_v29  ;;  %vm524_vm3 = vweird.f32 %v3162_v49 }
  0x87   : > { %v382_v38 = vmul.f32 %v3082_v21, %v381_v55  ;;  %1521 = vmatpush.msrb.mxu0 %v1169_v60  ;;  %vm389_vm1 = vcmp.eq.f32.partialorder %v388_v51, 8.507059e+37  ;;  %vm398_vm7 = vweird.f32 %v3180_v28 }
  0x88   : > { %v509_v42 = vadd.f32 %v3040_v58, %v508_v61  ;;  %1287 = vmatpush.msrb.mxu2 %v3045_v53 }
  0x89   : > { %882 = vrot.lane.b32.xlu0 %v835_v13, %s2725_s12  ;;  %767 = vrot.lane.b32.xlu1 %v729_v47, %s2724_s11  ;;  %v1201_v47 = vand.u32 4294901760, %v1200_v2  ;;  %v383_v60 = vadd.f32 %v3082_v21, %v382_v38 }
  0x8a   : > { %864 = vrot.lane.b32.xlu2 %v826_v14, %s2725_s12  ;;  %v390_v14 = vand.u32 2147483648, %v2986_v25  ;;  %v513_v17 = vsel %vm3210_vm9, %v3040_v58, %v509_v42  ;;  %1290 = vmatpush.msrb.mxu2 %v3059_v7  ;;  %v301_v25 = vsub.f32 0.0, %v2903_v23  ;;  %v292_v7 = vsub.f32 0.0, %v2932_v52 }
  0x8b   : > { %v677_v59 = vpop.permute.xlu1 %676  ;;  %v675_v32 = vpop.permute.xlu0 %674  ;;  %2506 = vmatpush.msra.mxu3 %v1201_v47  ;;  %1202 = vmatpush.msra.mxu1 %v1201_v47  ;;  %v387_v48 = vsel %vm3231_vm15, %v3082_v21, %v383_v60  ;;  %v402_v47 = vand.u32 2147483647, %v3180_v28  ;;  %v302_v60 = vsub.f32 0.0, %v2989_v26  ;;  %v293_v58 = vsub.f32 0.0, %v3032_v50 }
  0x8c   : > { %716 = vst.msk [vmem:[#allocation2 + $0x48] sm:$0xff] %vm706_vm13, %v677_v59  ;;  %v661_v56 = vpop.permute.xlu2 %660  ;;  %v391_v19 = vor.u32 1.1754944e-38, %v390_v14  ;;  %1525 = vmatpush.msrb.mxu0 %v1175_v15  ;;  %1293 = vmatpush.msrb.mxu2 %v3078_v11  ;;  %v528_v59 = vand.u32 2147483647, %v3162_v49 }
  0x8d   : > { %715 = vst.msk [vmem:[#allocation2 + $0x40] sm:$0xff] %vm706_vm13, %v675_v32  ;;  %1390 = vmatpush.msrb.mxu3 %v2969_v18  ;;  %1616 = vmatpush.msrb.mxu1 %v2969_v18  ;;  %v3226_v18 = vpop.eup %2564  ;;  %vm3325_vm12 = vcmp.eq.f32.partialorder %v402_v47, 8.507059e+37 }
  0x8e   : > { %813 = vst.msk [vmem:[#allocation2 + $0x48] sm:$0xff] %vm803_vm6, %v3084_v1  ;;  %v517_v1 = vor.u32 1.1754944e-38, %v516_v31  ;;  %v2567_v5 = vpop.eup %2566  ;;  %v392_v2 = vsel %vm389_vm1, %v391_v19, %v387_v48  ;;  %1529 = vmatpush.msrb.mxu0 %v1181_v4  ;;  %1296 = vmatpush.msrb.mxu2 %v3122_v12  ;;  %v313_v12 = vmul.f32 1.442695, %v292_v7  ;;  %vm525_vm4 = vweird.f32 %v3226_v18 }
  0x8f   : > { %708 = vst.msk [vmem:[#allocation2 + $0x8] sm:$0xff] %vm706_vm13, %v661_v56  ;;  %1392 = vmatpush.msrb.mxu3 %v2983_v22  ;;  %1618 = vmatpush.msrb.mxu1 %v2983_v22  ;;  %v3238_v22 = vpop.eup %2568  ;;  %v577_v21 = vmul.f32 %v392_v2, %v2837_v30  ;;  %v3262_v23 = vadd.f32 1.0, %v2567_v5  ;;  %v331_v30 = vmul.f32 1.442695, %v301_v25  ;;  %vm3301_vm5 = vmor %vm524_vm3, %vm525_vm4  ;;  %vm529_vm9 = vcmp.eq.f32.partialorder %v528_v59, 8.507059e+37 }
  0x90   : > { %v518_v44 = vsel %vm515_vm10, %v517_v1, %v513_v17  ;;  %1299 = vmatpush.msrb.mxu2 %v3158_v40  ;;  %v394_v15 = vmul.f32 %v3238_v22, %v3180_v28  ;;  %vm399_vm8 = vweird.f32 %v3238_v22 }
  0x91   : > { %672 = vrot.lane.b32.xlu0 %v633_v37, %s2723_s10  ;;  %769 = vrot.lane.b32.xlu1 %v730_v39, %s2724_s11  ;;  %v586_v9 = vmul.f32 %v518_v44, %v2828_v24  ;;  %v2571_v24 = vpop.eup %2570  ;;  %594 = vst.msk [vmem:[#allocation2 + $0x10] sm:$0xff] %vm591_vm11, %v577_v21  ;;  %2572 = vrcp.f32 %v3262_v23  ;;  %vm3320_vm10 = vmor %vm398_vm7, %vm399_vm8  ;;  %vm538_vm14 = vweird.f32 %v3262_v23 }
  0x92   : > { %866 = vrot.lane.b32.xlu2 %v827_v0, %s2725_s12  ;;  %1394 = vmatpush.msrb.mxu3 %v3001_v33  ;;  %v3273_v53 = vadd.f32 1.0, %v2571_v24  ;;  %2574 = vpow2.f32 %v331_v30  ;;  %v395_v3 = vsub.f32 1.0, %v394_v15  ;;  %v404_v0 = vand.u32 2147483648, %v3180_v28 }
  0x93   : > { %v772_v37 = vpop.permute.xlu0 %771  ;;  %v756_v27 = vpop.permute.xlu1 %755  ;;  %1620 = vmatpush.msrb.mxu1 %v3001_v33  ;;  %603 = vst.msk [vmem:[#allocation2 + $0x58] sm:$0xff] %vm591_vm11, %v586_v9  ;;  %v520_v33 = vmul.f32 %v3226_v18, %v3162_v49  ;;  %v333_v24 = vmul.f32 1.442695, %v302_v60 }
  0x94   : > { %812 = vst.msk [vmem:[#allocation2 + $0x40] sm:$0xff] %vm803_vm6, %v772_v37  ;;  %v3248_v41 = vpop.permute.xlu2 %854  ;;  %1396 = vmatpush.msrb.mxu3 %v3024_v45  ;;  %2576 = vrcp.f32 %v3273_v53  ;;  %v405_v28 = vor.u32 1.1754944e-38, %v404_v0  ;;  %vm412_vm3 = vweird.f32 %v3273_v53 }
  0x95   : > { %804 = vst.msk [vmem:[#allocation2] sm:$0xff] %vm803_vm6, %v756_v27  ;;  %1622 = vmatpush.msrb.mxu1 %v3024_v45  ;;  %v4403_v45 = vand.u32 4294901760, %v3078_v11  ;;  %2578 = vpow2.f32 %v313_v12 }
  0x96   : > { %901 = vst.msk [vmem:[#allocation2] sm:$0xff] %vm900_vm0, %v3149_v62  ;;  %1398 = vmatpush.msrb.mxu3 %v3037_v57 }
  0x97   : > { %1624 = vmatpush.msrb.mxu1 %v3037_v57  ;;  %1533 = vmatpush.msrb.mxu0 %v4403_v45  ;;  %v521_v57 = vsub.f32 1.0, %v520_v33  ;;  %v3313_v56 = vpop.eup %2572  ;;  %v315_v33 = vmul.f32 1.442695, %v293_v58 }
  0x98   : > { %1400 = vmatpush.msrb.mxu3 %v3061_v8  ;;  %v2575_v31 = vpop.eup %2574  ;;  %v534_v30 = vmul.f32 %v3313_v56, %v3262_v23  ;;  %vm539_vm15 = vweird.f32 %v3313_v56 }
  0x99   : > { %1626 = vmatpush.msrb.mxu1 %v3061_v8  ;;  %1537 = vmatpush.msrb.mxu0 %v1193_v16  ;;  %v522_v62 = vmul.f32 %v3226_v18, %v521_v57  ;;  %v3355_v25 = vadd.f32 1.0, %v2575_v31  ;;  %vm3387_vm1 = vmor %vm538_vm14, %vm539_vm15 }
  0x9a   : > { %1402 = vmatpush.msrb.mxu3 %v3090_v35  ;;  %v3329_v13 = vpop.eup %2576  ;;  %v535_v57 = vsub.f32 1.0, %v534_v30 }
  0x9b   : > { %v871_v4 = vpop.permute.xlu0 %870  ;;  %v869_v11 = vpop.permute.xlu1 %868  ;;  %1628 = vmatpush.msrb.mxu1 %v3090_v35  ;;  %1541 = vmatpush.msrb.mxu0 %v1199_v34  ;;  %v530_v35 = vand.u32 2147483648, %v3162_v49  ;;  %v523_v29 = vadd.f32 %v3226_v18, %v522_v62  ;;  %v408_v15 = vmul.f32 %v3329_v13, %v3273_v53  ;;  %2580 = vrcp.f32 %v3355_v25 }
  0x9c   : > { %910 = vst.msk [vmem:[#allocation2 + $0x48] sm:$0xff] %vm900_vm0, %v871_v4  ;;  %v663_v8 = vpop.permute.xlu2 %662  ;;  %1404 = vmatpush.msrb.mxu3 %v3146_v43  ;;  %2582 = vpow2.f32 %v333_v24  ;;  %vm413_vm4 = vweird.f32 %v3329_v13 }
  0x9d   : > { %909 = vst.msk [vmem:[#allocation2 + $0x40] sm:$0xff] %vm900_vm0, %v869_v11  ;;  %v917_v16 = vld [vmem:[#allocation2] sm:$0xff]  ;;  %1630 = vmatpush.msrb.mxu1 %v3146_v43  ;;  %v531_v32 = vor.u32 1.1754944e-38, %v530_v35  ;;  %v396_v43 = vmul.f32 %v3238_v22, %v395_v3  ;;  %v527_v39 = vsel %vm3301_vm5, %v3226_v18, %v523_v29  ;;  %v536_v3 = vmul.f32 %v3313_v56, %v535_v57  ;;  %vm3405_vm7 = vmor %vm412_vm3, %vm413_vm4 }
  0x9e   : > { %v947_v20 = vsel %vm945_vm2, %v917_v16, 0  ;;  %709 = vst.msk [vmem:[#allocation2 + $0x10] sm:$0xff] %vm706_vm13, %v663_v8  ;;  %v409_v12 = vsub.f32 1.0, %v408_v15  ;;  %2584 = vpow2.f32 %v315_v33 }
  0x9f   : > { %v3299_v40 = vand.u32 4294901760, %v947_v20  ;;  %v397_v49 = vadd.f32 %v3238_v22, %v396_v43  ;;  %v532_v42 = vsel %vm529_vm9, %v531_v32, %v527_v39  ;;  %v537_v34 = vadd.f32 %v3313_v56, %v536_v3 }
  0xa0   : > { %v587_v18 = vmul.f32 %v532_v42, %v2848_v36  ;;  %v542_v32 = vand.u32 2147483647, %v3262_v23  ;;  %v410_v39 = vmul.f32 %v3329_v13, %v409_v12  ;;  %vm552_vm9 = vweird.f32 %v3355_v25 }
  0xa1   : > { %v3316_v61 = vsub.f32 %v947_v20, %v3299_v40  ;;  %1204 = vmatmul.f32.vlgmr.msra.gmra.mxu1 %v3299_v40  ;;  %v401_v44 = vsel %vm3320_vm10, %v3238_v22, %v397_v49  ;;  %v544_v20 = vand.u32 2147483648, %v3262_v23  ;;  %v541_v47 = vsel %vm3387_vm1, %v3313_v56, %v537_v34 }
  0xa2   : > { %v406_v27 = vsel %vm3325_vm12, %v405_v28, %v401_v44  ;;  %604 = vst.msk [vmem:[#allocation2 + $0x60] sm:$0xff] %vm591_vm11, %v587_v18  ;;  %v416_v49 = vand.u32 2147483647, %v3273_v53  ;;  %vm543_vm5 = vcmp.eq.f32.partialorder %v542_v32, 8.507059e+37  ;;  %v411_v23 = vadd.f32 %v3329_v13, %v410_v39 }
  0xa3   : > { %v679_v1 = vpop.permute.xlu0 %678  ;;  %v776_v38 = vpop.permute.xlu1 %775  ;;  %v1020_v14 = vand.u32 4294901760, %v3316_v61  ;;  %v926_v17 = vld [vmem:[#allocation2 + $0x48] sm:$0xff]  ;;  %v578_v48 = vmul.f32 %v406_v27, %v2858_v46  ;;  %v545_v43 = vor.u32 1.1754944e-38, %v544_v20  ;;  %v294_v28 = vsub.f32 0.0, %v3116_v6 }
  0xa4   : > { %717 = vst.msk [vmem:[#allocation2 + $0x50] sm:$0xff] %vm706_vm13, %v679_v1  ;;  %v925_v51 = vld [vmem:[#allocation2 + $0x40] sm:$0xff]  ;;  %v974_v19 = vsel %vm945_vm2, %v926_v17, 0  ;;  %v3340_v5 = vpop.permute.xlu2 %856  ;;  %v2579_v46 = vpop.eup %2578  ;;  %vm417_vm8 = vcmp.eq.f32.partialorder %v416_v49, 8.507059e+37  ;;  %v415_v44 = vsel %vm3405_vm7, %v3329_v13, %v411_v23  ;;  %v558_v32 = vand.u32 2147483648, %v3355_v25 }
  0xa5   : > { %814 = vst.msk [vmem:[#allocation2 + $0x50] sm:$0xff] %vm803_vm6, %v776_v38  ;;  %v971_v36 = vsel %vm945_vm2, %v925_v51, 0  ;;  %v1021_v22 = vsub.f32 %v3316_v61, %v1020_v14  ;;  %v3347_v37 = vand.u32 4294901760, %v974_v19  ;;  %v3376_v16 = vadd.f32 1.0, %v2579_v46  ;;  %v3401_v55 = vpop.eup %2580 }
  0xa6   : > { %v3351_v9 = vand.u32 4294901760, %v971_v36  ;;  %595 = vst.msk [vmem:[#allocation2 + $0x18] sm:$0xff] %vm591_vm11, %v578_v48  ;;  %v2583_v42 = vpop.eup %2582  ;;  %v546_v10 = vsel %vm543_vm5, %v545_v43, %v541_v47  ;;  %v317_v30 = vmul.f32 1.442695, %v294_v28  ;;  %vm553_vm10 = vweird.f32 %v3401_v55 }
  0xa7   : > { %v1022_v2 = vand.u32 4294901760, %v1021_v22  ;;  %v3365_v45 = vsub.f32 %v974_v19, %v3347_v37  ;;  %2586 = vrcp.f32 %v3376_v16  ;;  %v588_v18 = vmul.f32 %v546_v10, %v2869_v54  ;;  %vm554_vm12 = vmor %vm552_vm9, %vm553_vm10 }
  0xa8   : > { %1236 = vmatmul.f32.vlgmr.msra.gmra.mxu3 %v3351_v9  ;;  %v3359_v21 = vsub.f32 %v971_v36, %v3351_v9  ;;  %v3429_v48 = vadd.f32 1.0, %v2583_v42  ;;  %v556_v39 = vand.u32 2147483647, %v3355_v25  ;;  %v559_v47 = vor.u32 1.1754944e-38, %v558_v32 }
  0xa9   : > { %1023 = vmatmul.f32.vlgmr.msra.gmra.mxu0 %v1022_v2  ;;  %v1092_v35 = vand.u32 4294901760, %v3365_v45  ;;  %605 = vst.msk [vmem:[#allocation2 + $0x68] sm:$0xff] %vm591_vm11, %v588_v18  ;;  %v432_v23 = vand.u32 2147483648, %v3376_v16  ;;  %vm426_vm15 = vweird.f32 %v3376_v16 }
  0xaa   : > { %v1084_v7 = vand.u32 4294901760, %v3359_v21  ;;  %2588 = vrcp.f32 %v3429_v48  ;;  %vm557_vm14 = vcmp.eq.f32.partialorder %v556_v39, 8.507059e+37  ;;  %vm566_vm5 = vweird.f32 %v3429_v48 }
  0xab   : > { %v873_v4 = vpop.permute.xlu0 %872  ;;  %v758_v11 = vpop.permute.xlu1 %757  ;;  %v1093_v56 = vsub.f32 %v3365_v45, %v1092_v35  ;;  %2590 = vpow2.f32 %v317_v30  ;;  %v433_v10 = vor.u32 1.1754944e-38, %v432_v23 }
  0xac   : > { %911 = vst.msk [vmem:[#allocation2 + $0x50] sm:$0xff] %vm900_vm0, %v873_v4  ;;  %v1085_v8 = vsub.f32 %v3359_v21, %v1084_v7  ;;  %v665_v62 = vpop.permute.xlu2 %664 }
  0xad   : > { %805 = vst.msk [vmem:[#allocation2 + $0x8] sm:$0xff] %vm803_vm6, %v758_v11  ;;  %v1094_v22 = vand.u32 4294901760, %v1093_v56  ;;  %v430_v56 = vand.u32 2147483647, %v3376_v16 }
  0xae   : > { %902 = vst.msk [vmem:[#allocation2 + $0x8] sm:$0xff] %vm900_vm0, %v3248_v41  ;;  %v1086_v29 = vand.u32 4294901760, %v1085_v8  ;;  %v418_v41 = vand.u32 2147483648, %v3273_v53  ;;  %v2585_v53 = vpop.eup %2584 }
  0xaf   : > { %710 = vst.msk [vmem:[#allocation2 + $0x18] sm:$0xff] %vm706_vm13, %v665_v62  ;;  %v3427_v13 = vpop.eup %2586  ;;  %v3440_v33 = vadd.f32 1.0, %v2585_v53  ;;  %vm431_vm4 = vcmp.eq.f32.partialorder %v430_v56, 8.507059e+37 }
  0xb0   : > { %1087 = vmatmul.f32.vlgmr.msra.gmra.mxu2 %v1086_v29  ;;  %1240 = vmatmul.f32.gmra.mxu3 %v3347_v37  ;;  %v419_v31 = vor.u32 1.1754944e-38, %v418_v41  ;;  %v422_v4 = vmul.f32 %v3427_v13, %v3376_v16  ;;  %vm427_vm1 = vweird.f32 %v3427_v13  ;;  %v3474_v0 = vpop.eup %2588 }
  0xb1   : > { %2592 = vrcp.f32 %v3440_v33  ;;  %vm3477_vm3 = vmor %vm426_vm15, %vm427_vm1  ;;  %v2591_v53 = vpop.eup %2590  ;;  %vm567_vm7 = vweird.f32 %v3474_v0  ;;  %vm440_vm10 = vweird.f32 %v3440_v33  ;;  %v444_v56 = vand.u32 2147483647, %v3440_v33 }
  0xb2   : > { %v420_v51 = vsel %vm417_vm8, %v419_v31, %v415_v44  ;;  %v423_v29 = vsub.f32 1.0, %v422_v4  ;;  %vm568_vm8 = vmor %vm566_vm5, %vm567_vm7 }
  0xb3   : > { %v681_v1 = vpop.permute.xlu0 %680  ;;  %v778_v38 = vpop.permute.xlu1 %777  ;;  %v927_v17 = vld [vmem:[#allocation2 + $0x50] sm:$0xff]  ;;  %v579_v54 = vmul.f32 %v420_v51, %v2880_v63  ;;  %v548_v63 = vmul.f32 %v3401_v55, %v3355_v25  ;;  %vm445_vm15 = vcmp.eq.f32.partialorder %v444_v56, 8.507059e+37 }
  0xb4   : > { %718 = vst.msk [vmem:[#allocation2 + $0x58] sm:$0xff] %vm706_vm13, %v681_v1  ;;  %v977_v60 = vsel %vm945_vm2, %v927_v17, 0  ;;  %v3419_v58 = vpop.permute.xlu2 %858  ;;  %v424_v49 = vmul.f32 %v3427_v13, %v423_v29 }
  0xb5   : > { %815 = vst.msk [vmem:[#allocation2 + $0x58] sm:$0xff] %vm803_vm6, %v778_v38  ;;  %v3422_v19 = vand.u32 4294901760, %v977_v60  ;;  %v918_v36 = vld [vmem:[#allocation2 + $0x8] sm:$0xff]  ;;  %v549_v15 = vsub.f32 1.0, %v548_v63  ;;  %v562_v63 = vmul.f32 %v3474_v0, %v3429_v48 }
  0xb6   : > { %v950_v27 = vsel %vm945_vm2, %v918_v36, 0  ;;  %596 = vst.msk [vmem:[#allocation2 + $0x20] sm:$0xff] %vm591_vm11, %v579_v54  ;;  %v425_v31 = vadd.f32 %v3427_v13, %v424_v49  ;;  %v570_v49 = vand.u32 2147483647, %v3429_v48 }
  0xb7   : > { %v3431_v2 = vand.u32 4294901760, %v950_v27  ;;  %v3434_v24 = vsub.f32 %v977_v60, %v3422_v19  ;;  %v550_v20 = vmul.f32 %v3401_v55, %v549_v15  ;;  %v3483_v38 = vpop.eup %2592  ;;  %v3507_v15 = vadd.f32 1.0, %v2591_v53 }
  0xb8   : > { %1095 = vmatmul.f32.gmra.mxu2 %v1094_v22  ;;  %1244 = vmatmul.f32.gmra.mxu3 %v3422_v19  ;;  %v429_v28 = vsel %vm3477_vm3, %v3427_v13, %v425_v31  ;;  %v446_v31 = vand.u32 2147483648, %v3440_v33  ;;  %vm571_vm9 = vcmp.eq.f32.partialorder %v570_v49, 8.507059e+37 }
  0xb9   : > { %1208 = vmatmul.f32.gmra.mxu1 %v3431_v2  ;;  %v1100_v46 = vand.u32 4294901760, %v3434_v24  ;;  %v3445_v57 = vsub.f32 %v950_v27, %v3431_v2  ;;  %v551_v43 = vadd.f32 %v3401_v55, %v550_v20  ;;  %v434_v16 = vsel %vm431_vm4, %v433_v10, %v429_v28 }
  0xba   : > { %v580_v22 = vmul.f32 %v434_v16, %v2932_v52  ;;  %2594 = vrcp.f32 %v3507_v15  ;;  %v447_v10 = vor.u32 1.1754944e-38, %v446_v31  ;;  %vm454_vm1 = vweird.f32 %v3507_v15 }
  0xbb   : > { %v875_v11 = vpop.permute.xlu0 %874  ;;  %v760_v8 = vpop.permute.xlu1 %759  ;;  %v1101_v62 = vsub.f32 %v3434_v24, %v1100_v46  ;;  %v1028_v3 = vand.u32 4294901760, %v3445_v57 }
  0xbc   : > { %912 = vst.msk [vmem:[#allocation2 + $0x58] sm:$0xff] %vm900_vm0, %v875_v11  ;;  %v667_v12 = vpop.permute.xlu2 %666  ;;  %v563_v11 = vsub.f32 1.0, %v562_v63 }
  0xbd   : > { %806 = vst.msk [vmem:[#allocation2 + $0x10] sm:$0xff] %vm803_vm6, %v760_v8  ;;  %v1102_v34 = vand.u32 4294901760, %v1101_v62  ;;  %v1029_v59 = vsub.f32 %v3445_v57, %v1028_v3  ;;  %v436_v8 = vmul.f32 %v3483_v38, %v3440_v33 }
  0xbe   : > { %903 = vst.msk [vmem:[#allocation2 + $0x10] sm:$0xff] %vm900_vm0, %v3340_v5  ;;  %v555_v5 = vsel %vm554_vm12, %v3401_v55, %v551_v43  ;;  %v2692_v55 = vld [vmem:[%s2780_s9 + $0x70] sm:$0xff]  ;;  %vm441_vm12 = vweird.f32 %v3483_v38 }
  0xbf   : > { %v1030_v41 = vand.u32 4294901760, %v1029_v59  ;;  %711 = vst.msk [vmem:[#allocation2 + $0x20] sm:$0xff] %vm706_vm13, %v667_v12  ;;  %v560_v25 = vsel %vm557_vm14, %v559_v47, %v555_v5  ;;  %v564_v59 = vmul.f32 %v3474_v0, %v563_v11  ;;  %v437_v32 = vsub.f32 1.0, %v436_v8  ;;  %vm442_vm14 = vmor %vm440_vm10, %vm441_vm12 }
  0xc0   : > { %1103 = vmatmul.f32.gmra.mxu2 %v1102_v34  ;;  %v589_v1 = vmul.f32 %v2692_v55, %v560_v25  ;;  %597 = vst.msk [vmem:[#allocation2 + $0x28] sm:$0xff] %vm591_vm11, %v580_v22  ;;  %v2595_v55 = vpop.eup %2594 }
  0xc1   : > { %1031 = vmatmul.f32.gmra.mxu0 %v1030_v41  ;;  %v572_v41 = vand.u32 2147483648, %v3429_v48  ;;  %v565_v47 = vadd.f32 %v3474_v0, %v564_v59  ;;  %v438_v25 = vmul.f32 %v3483_v38, %v437_v32  ;;  %vm455_vm3 = vweird.f32 %v2595_v55 }
  0xc2   : > { %606 = vst.msk [vmem:[#allocation2 + $0x70] sm:$0xff] %vm591_vm11, %v589_v1  ;;  %vm456_vm4 = vmor %vm454_vm1, %vm455_vm3 }
  0xc3   : > { %v683_v17 = vpop.permute.xlu0 %682  ;;  %v780_v18 = vpop.permute.xlu1 %779  ;;  %v928_v44 = vld [vmem:[#allocation2 + $0x58] sm:$0xff]  ;;  %v573_v5 = vor.u32 1.1754944e-38, %v572_v41  ;;  %v439_v48 = vadd.f32 %v3483_v38, %v438_v25 }
  0xc4   : > { %719 = vst.msk [vmem:[#allocation2 + $0x60] sm:$0xff] %vm706_vm13, %v683_v17  ;;  %v980_v60 = vsel %vm945_vm2, %v928_v44, 0  ;;  %v3490_v51 = vpop.permute.xlu2 %860 }
  0xc5   : > { %816 = vst.msk [vmem:[#allocation2 + $0x60] sm:$0xff] %vm803_vm6, %v780_v18  ;;  %v3493_v36 = vand.u32 4294901760, %v980_v60  ;;  %v919_v54 = vld [vmem:[#allocation2 + $0x10] sm:$0xff] }
  0xc6   : > { %v953_v27 = vsel %vm945_vm2, %v919_v54, 0 }
  0xc7   : > { %1248 = vmatmul.f32.gmra.mxu3 %v3493_v36  ;;  %v3499_v13 = vand.u32 4294901760, %v953_v27  ;;  %v3502_v30 = vsub.f32 %v980_v60, %v3493_v36 }
  0xc9   : > { %1212 = vmatmul.f32.gmra.mxu1 %v3499_v13  ;;  %v1108_v52 = vand.u32 4294901760, %v3502_v30  ;;  %v3512_v4 = vsub.f32 %v953_v27, %v3499_v13  ;;  %v450_v27 = vmul.f32 %v2595_v55, %v3507_v15 }
  0xcb   : > { %v877_v62 = vpop.permute.xlu0 %876  ;;  %v762_v12 = vpop.permute.xlu1 %761  ;;  %v1109_v20 = vsub.f32 %v3502_v30, %v1108_v52  ;;  %v1036_v29 = vand.u32 4294901760, %v3512_v4  ;;  %v451_v11 = vsub.f32 1.0, %v450_v27 }
  0xcc   : > { %913 = vst.msk [vmem:[#allocation2 + $0x60] sm:$0xff] %vm900_vm0, %v877_v62  ;;  %v669_v34 = vpop.permute.xlu2 %668 }
  0xcd   : > { %807 = vst.msk [vmem:[#allocation2 + $0x18] sm:$0xff] %vm803_vm6, %v762_v12  ;;  %v1110_v43 = vand.u32 4294901760, %v1109_v20  ;;  %v1037_v39 = vsub.f32 %v3512_v4, %v1036_v29  ;;  %v452_v59 = vmul.f32 %v2595_v55, %v451_v11 }
  0xce   : > { %904 = vst.msk [vmem:[#allocation2 + $0x18] sm:$0xff] %vm900_vm0, %v3419_v58  ;;  %v569_v58 = vsel %vm568_vm8, %v3474_v0, %v565_v47  ;;  %v443_v0 = vsel %vm442_vm14, %v3483_v38, %v439_v48  ;;  %v458_v47 = vand.u32 2147483647, %v3507_v15 }
  0xcf   : > { %1111 = vmatmul.f32.gmra.mxu2 %v1110_v43  ;;  %v1038_v23 = vand.u32 4294901760, %v1037_v39  ;;  %712 = vst.msk [vmem:[#allocation2 + $0x28] sm:$0xff] %vm706_vm13, %v669_v34  ;;  %v574_v42 = vsel %vm571_vm9, %v573_v5, %v569_v58  ;;  %v448_v60 = vsel %vm445_vm15, %v447_v10, %v443_v0  ;;  %v460_v39 = vand.u32 2147483648, %v3507_v15 }
  0xd0   : > { %v590_v53 = vmul.f32 %v574_v42, %v2989_v26  ;;  %v581_v26 = vmul.f32 %v448_v60, %v3032_v50  ;;  %v453_v41 = vadd.f32 %v2595_v55, %v452_v59  ;;  %vm459_vm5 = vcmp.eq.f32.partialorder %v458_v47, 8.507059e+37 }
  0xd1   : > { %1039 = vmatmul.f32.gmra.mxu0 %v1038_v23  ;;  %v461_v23 = vor.u32 1.1754944e-38, %v460_v39 }
  0xd2   : > { %607 = vst.msk [vmem:[#allocation2 + $0x78] sm:$0xff] %vm591_vm11, %v590_v53  ;;  %v457_v5 = vsel %vm456_vm4, %v2595_v55, %v453_v41 }
  0xd3   : > { %v685_v1 = vpop.permute.xlu0 %684  ;;  %v782_v17 = vpop.permute.xlu1 %781  ;;  %v929_v18 = vld [vmem:[#allocation2 + $0x60] sm:$0xff]  ;;  %598 = vst.msk [vmem:[#allocation2 + $0x30] sm:$0xff] %vm591_vm11, %v581_v26  ;;  %v462_v25 = vsel %vm459_vm5, %v461_v23, %v457_v5 }
  0xd4   : > { %720 = vst.msk [vmem:[#allocation2 + $0x68] sm:$0xff] %vm706_vm13, %v685_v1  ;;  %v983_v44 = vsel %vm945_vm2, %v929_v18, 0  ;;  %v3546_v28 = vpop.permute.xlu2 %862  ;;  %v582_v31 = vmul.f32 %v462_v25, %v3116_v6 }
  0xd5   : > { %817 = vst.msk [vmem:[#allocation2 + $0x68] sm:$0xff] %vm803_vm6, %v782_v17  ;;  %v3549_v33 = vand.u32 4294901760, %v983_v44  ;;  %v920_v16 = vld [vmem:[#allocation2 + $0x18] sm:$0xff] }
  0xd6   : > { %v956_v54 = vsel %vm945_vm2, %v920_v16, 0  ;;  %599 = vst.msk [vmem:[#allocation2 + $0x38] sm:$0xff] %vm591_vm11, %v582_v31  ;;  %vm1696_vm11 = vcmask 261120  }
  0xd7   : > { %1252 = vmatmul.f32.gmra.mxu3 %v3549_v33  ;;  %v3555_v38 = vand.u32 4294901760, %v956_v54  ;;  %v3558_v22 = vsub.f32 %v983_v44, %v3549_v33 }
  0xd9   : > { %1216 = vmatmul.f32.gmra.mxu1 %v3555_v38  ;;  %v1116_v63 = vand.u32 4294901760, %v3558_v22  ;;  %v3565_v50 = vsub.f32 %v956_v54, %v3555_v38 }
  0xdb   : > { %v879_v8 = vpop.permute.xlu0 %878  ;;  %v764_v62 = vpop.permute.xlu1 %763  ;;  %v1117_v12 = vsub.f32 %v3558_v22, %v1116_v63  ;;  %v1044_v20 = vand.u32 4294901760, %v3565_v50 }
  0xdc   : > { %914 = vst.msk [vmem:[#allocation2 + $0x68] sm:$0xff] %vm900_vm0, %v879_v8  ;;  %v671_v34 = vpop.permute.xlu2 %670 }
  0xdd   : > { %808 = vst.msk [vmem:[#allocation2 + $0x20] sm:$0xff] %vm803_vm6, %v764_v62  ;;  %v1118_v32 = vand.u32 4294901760, %v1117_v12  ;;  %v1045_v43 = vsub.f32 %v3565_v50, %v1044_v20 }
  0xde   : > { %905 = vst.msk [vmem:[#allocation2 + $0x20] sm:$0xff] %vm900_vm0, %v3490_v51 }
  0xdf   : > { %1119 = vmatmul.f32.gmra.mxu2 %v1118_v32  ;;  %v1046_v49 = vand.u32 4294901760, %v1045_v43  ;;  %713 = vst.msk [vmem:[#allocation2 + $0x30] sm:$0xff] %vm706_vm13, %v671_v34 }
  0xe1   : > { %1047 = vmatmul.f32.gmra.mxu0 %v1046_v49 }
  0xe3   : > { %v687_v58 = vpop.permute.xlu0 %686  ;;  %v784_v51 = vpop.permute.xlu1 %783  ;;  %v930_v42 = vld [vmem:[#allocation2 + $0x68] sm:$0xff] }
  0xe4   : > { %721 = vst.msk [vmem:[#allocation2 + $0x70] sm:$0xff] %vm706_vm13, %v687_v58  ;;  %v986_v48 = vsel %vm945_vm2, %v930_v42, 0  ;;  %v865_v32 = vpop.permute.xlu2 %864 }
  0xe5   : > { %818 = vst.msk [vmem:[#allocation2 + $0x70] sm:$0xff] %vm803_vm6, %v784_v51  ;;  %v3586_v15 = vand.u32 4294901760, %v986_v48  ;;  %v921_v56 = vld [vmem:[#allocation2 + $0x20] sm:$0xff] }
  0xe6   : > { %v959_v10 = vsel %vm945_vm2, %v921_v56, 0 }
  0xe7   : > { %1256 = vmatmul.f32.gmra.mxu3 %v3586_v15  ;;  %v3591_v53 = vand.u32 4294901760, %v959_v10  ;;  %v3594_v6 = vsub.f32 %v986_v48, %v3586_v15 }
  0xe9   : > { %1220 = vmatmul.f32.gmra.mxu1 %v3591_v53  ;;  %v1124_v55 = vand.u32 4294901760, %v3594_v6  ;;  %v3599_v1 = vsub.f32 %v959_v10, %v3591_v53 }
  0xeb   : > { %v881_v17 = vpop.permute.xlu0 %880  ;;  %v766_v18 = vpop.permute.xlu1 %765  ;;  %v1125_v0 = vsub.f32 %v3594_v6, %v1124_v55  ;;  %v1052_v44 = vand.u32 4294901760, %v3599_v1 }
  0xec   : > { %915 = vst.msk [vmem:[#allocation2 + $0x70] sm:$0xff] %vm900_vm0, %v881_v17  ;;  %v867_v58 = vpop.permute.xlu2 %866 }
  0xed   : > { %809 = vst.msk [vmem:[#allocation2 + $0x28] sm:$0xff] %vm803_vm6, %v766_v18  ;;  %v1126_v60 = vand.u32 4294901760, %v1125_v0  ;;  %v1053_v16 = vsub.f32 %v3599_v1, %v1052_v44 }
  0xee   : > { %906 = vst.msk [vmem:[#allocation2 + $0x28] sm:$0xff] %vm900_vm0, %v3546_v28 }
  0xef   : > { %1127 = vmatmul.f32.gmra.mxu2 %v1126_v60  ;;  %v1054_v26 = vand.u32 4294901760, %v1053_v16 }
  0xf1   : > { %1055 = vmatmul.f32.gmra.mxu0 %v1054_v26 }
  0xf3   : > { %v689_v54 = vpop.permute.xlu0 %688  ;;  %v786_v27 = vpop.permute.xlu1 %785  ;;  %v931_v11 = vld [vmem:[#allocation2 + $0x70] sm:$0xff] }
  0xf4   : > { %722 = vst.msk [vmem:[#allocation2 + $0x78] sm:$0xff] %vm706_vm13, %v689_v54  ;;  %v989_v8 = vsel %vm945_vm2, %v931_v11, 0 }
  0xf5   : > { %819 = vst.msk [vmem:[#allocation2 + $0x78] sm:$0xff] %vm803_vm6, %v786_v27  ;;  %v3615_v62 = vand.u32 4294901760, %v989_v8  ;;  %v922_v12 = vld [vmem:[#allocation2 + $0x28] sm:$0xff] }
  0xf6   : > { %v962_v34 = vsel %vm945_vm2, %v922_v12, 0 }
  0xf7   : > { %1260 = vmatmul.f32.gmra.mxu3 %v3615_v62  ;;  %v3619_v28 = vand.u32 4294901760, %v962_v34  ;;  %v3622_v59 = vsub.f32 %v989_v8, %v3615_v62 }
  0xf9   : > { %1224 = vmatmul.f32.gmra.mxu1 %v3619_v28  ;;  %v1132_v43 = vand.u32 4294901760, %v3622_v59  ;;  %v3627_v39 = vsub.f32 %v962_v34, %v3619_v28 }
  0xfb   : > { %v883_v41 = vpop.permute.xlu0 %882  ;;  %v768_v47 = vpop.permute.xlu1 %767  ;;  %v1133_v49 = vsub.f32 %v3622_v59, %v1132_v43  ;;  %v1060_v23 = vand.u32 4294901760, %v3627_v39 }
  0xfc   : > { %916 = vst.msk [vmem:[#allocation2 + $0x78] sm:$0xff] %vm900_vm0, %v883_v41 }
  0xfd   : > { %810 = vst.msk [vmem:[#allocation2 + $0x30] sm:$0xff] %vm803_vm6, %v768_v47  ;;  %v1134_v5 = vand.u32 4294901760, %v1133_v49  ;;  %v1061_v25 = vsub.f32 %v3627_v39, %v1060_v23 }
  0xfe   : > { %907 = vst.msk [vmem:[#allocation2 + $0x30] sm:$0xff] %vm900_vm0, %v865_v32 }
  0xff   : > { %1135 = vmatmul.f32.gmra.mxu2 %v1134_v5  ;;  %v1062_v31 = vand.u32 4294901760, %v1061_v25 }
 0x101   : > { %1063 = vmatmul.f32.gmra.mxu0 %v1062_v31 }
 0x103   : > { %v673_v51 = vpop.permute.xlu0 %672  ;;  %v770_v42 = vpop.permute.xlu1 %769  ;;  %v932_v48 = vld [vmem:[#allocation2 + $0x78] sm:$0xff] }
 0x104   : > { %714 = vst.msk [vmem:[#allocation2 + $0x38] sm:$0xff] %vm706_vm13, %v673_v51  ;;  %v992_v56 = vsel %vm945_vm2, %v932_v48, 0 }
 0x105   : > { %811 = vst.msk [vmem:[#allocation2 + $0x38] sm:$0xff] %vm803_vm6, %v770_v42  ;;  %v3642_v10 = vand.u32 4294901760, %v992_v56  ;;  %v923_v17 = vld [vmem:[#allocation2 + $0x30] sm:$0xff] }
 0x106   : > { %908 = vst.msk [vmem:[#allocation2 + $0x38] sm:$0xff] %vm900_vm0, %v867_v58  ;;  %v965_v18 = vsel %vm945_vm2, %v923_v17, 0 }
 0x107   : > { %1264 = vmatmul.f32.gmra.mxu3 %v3642_v10  ;;  %v3647_v0 = vand.u32 4294901760, %v965_v18  ;;  %v3650_v60 = vsub.f32 %v992_v56, %v3642_v10 }
 0x109   : > { %1228 = vmatmul.f32.gmra.mxu1 %v3647_v0  ;;  %v1140_v16 = vand.u32 4294901760, %v3650_v60  ;;  %v1067_v26 = vsub.f32 %v965_v18, %v3647_v0 }
 0x10b   : > { %v1141_v54 = vsub.f32 %v3650_v60, %v1140_v16  ;;  %v1068_v27 = vand.u32 4294901760, %v1067_v26 }
 0x10d   : > { %v1142_v11 = vand.u32 4294901760, %v1141_v54  ;;  %v1069_v8 = vsub.f32 %v1067_v26, %v1068_v27  ;;  %v924_v12 = vld [vmem:[#allocation2 + $0x38] sm:$0xff] }
 0x10e   : > { %v968_v34 = vsel %vm945_vm2, %v924_v12, 0 }
 0x10f   : > { %1143 = vmatmul.f32.gmra.mxu2 %v1142_v11  ;;  %1408 = vmatmul.f32.vlgmr.msrb.gmra.mxu3 %v1020_v14  ;;  %v1070_v32 = vand.u32 4294901760, %v1069_v8  ;;  %v1074_v41 = vand.u32 4294901760, %v968_v34 }
 0x111   : > { %1071 = vmatmul.f32.gmra.mxu0 %v1070_v32  ;;  %1232 = vmatmul.f32.gmra.mxu1 %v1074_v41  ;;  %v1075_v47 = vsub.f32 %v968_v34, %v1074_v41 }
 0x113   : > { %v1076_v49 = vand.u32 4294901760, %v1075_v47 }
 0x115   : > { %v1077_v5 = vsub.f32 %v1075_v47, %v1076_v49 }
 0x117   : > { %1302 = vmatmul.f32.vlgmr.msrb.gmra.mxu2 %v3316_v61  ;;  %1414 = vmatmul.f32.gmra.mxu3 %v1028_v3  ;;  %v1078_v25 = vand.u32 4294901760, %v1077_v5 }
 0x119   : > { %1079 = vmatmul.f32.gmra.mxu0 %v1078_v25  ;;  %1632 = vmatmul.f32.vlgmr.msrb.gmra.mxu1 %v3299_v40 }
 0x11e   : > { %v3710_v31 = vpop.f32.mrf.mxu1 }
 0x11f   : > { %1307 = vmatmul.f32.gmra.mxu2 %v3445_v57  ;;  %1420 = vmatmul.f32.gmra.mxu3 %v1036_v29 }
 0x121   : > { %1543 = vmatmul.f32.vlgmr.msrb.gmra.mxu0 %v3299_v40  ;;  %1636 = vmatmul.f32.gmra.mxu1 %v3431_v2  ;;  %v3683_v40 = vld [vmem:[%s4384_s3] ss:$0 sm:$0xff] }
 0x127   : > { %1312 = vmatmul.f32.gmra.mxu2 %v3512_v4  ;;  %1426 = vmatmul.f32.gmra.mxu3 %v1044_v20 }
 0x129   : > { %1547 = vmatmul.f32.gmra.mxu0 %v3431_v2  ;;  %1640 = vmatmul.f32.gmra.mxu1 %v3499_v13 }
 0x12b   : > { %v1237_v61 = vpop.f32.mrf.mxu3 }
 0x12f   : > { %1317 = vmatmul.f32.gmra.mxu2 %v3565_v50  ;;  %1432 = vmatmul.f32.gmra.mxu3 %v1052_v44 }
 0x131   : > { %1551 = vmatmul.f32.gmra.mxu0 %v3499_v13  ;;  %1644 = vmatmul.f32.gmra.mxu1 %v3555_v38 }
 0x133   : > { %v1088_v14 = vpop.f32.mrf.mxu2  ;;  %v1241_v3 = vpop.f32.mrf.mxu3 }
 0x134   : > { %v1089_v2 = vadd.f32 %v3683_v40, %v1088_v14 }
 0x136   : > { %v3686_v57 = vadd.f32 %v1237_v61, %v1089_v2 }
 0x137   : > { %1322 = vmatmul.f32.gmra.mxu2 %v3599_v1  ;;  %1438 = vmatmul.f32.gmra.mxu3 %v1060_v23 }
 0x139   : > { %1555 = vmatmul.f32.gmra.mxu0 %v3555_v38  ;;  %1648 = vmatmul.f32.gmra.mxu1 %v3591_v53 }
 0x13b   : > { %v1096_v13 = vpop.f32.mrf.mxu2  ;;  %v1245_v1 = vpop.f32.mrf.mxu3 }
 0x13c   : > { %v1097_v4 = vadd.f32 %v3683_v40, %v1096_v13 }
 0x13e   : > { %v3694_v29 = vadd.f32 %v1241_v3, %v1097_v4 }
 0x13f   : > { %1327 = vmatmul.f32.gmra.mxu2 %v3627_v39  ;;  %1444 = vmatmul.f32.gmra.mxu3 %v1068_v27 }
 0x141   : > { %1559 = vmatmul.f32.gmra.mxu0 %v3591_v53  ;;  %1652 = vmatmul.f32.gmra.mxu1 %v3619_v28 }
 0x143   : > { %v1104_v50 = vpop.f32.mrf.mxu2 }
 0x144   : > { %v1105_v20 = vadd.f32 %v3683_v40, %v1104_v50 }
 0x146   : > { %v3700_v38 = vadd.f32 %v1245_v1, %v1105_v20 }
 0x147   : > { %1332 = vmatmul.f32.gmra.mxu2 %v1067_v26  ;;  %1450 = vmatmul.f32.gmra.mxu3 %v1076_v49 }
 0x149   : > { %1563 = vmatmul.f32.gmra.mxu0 %v3619_v28  ;;  %1656 = vmatmul.f32.gmra.mxu1 %v3647_v0  ;;  %v3716_v28 = vpop.f32.mrf.mxu1 }
 0x14a   : > { %v1249_v39 = vpop.f32.mrf.mxu3 }
 0x14f   : > { %1337 = vmatmul.f32.gmra.mxu2 %v1075_v47  ;;  %1456 = vmatmul.f32.gmra.mxu3 %v1084_v7  ;;  %v1024_v7 = vpop.f32.mrf.mxu0 }
 0x151   : > { %1567 = vmatmul.f32.gmra.mxu0 %v3647_v0  ;;  %1660 = vmatmul.f32.gmra.mxu1 %v1074_v41  ;;  %v3726_v48 = vpop.f32.mrf.mxu1 }
 0x152   : > { %v1112_v53 = vpop.f32.mrf.mxu2 }
 0x153   : > { %v1113_v44 = vadd.f32 %v3683_v40, %v1112_v53 }
 0x155   : > { %v3708_v23 = vadd.f32 %v1249_v39, %v1113_v44 }
 0x157   : > { %1342 = vmatmul.f32.gmra.mxu2 %v3359_v21  ;;  %1462 = vmatmul.f32.gmra.mxu3 %v1092_v35  ;;  %v1032_v42 = vpop.f32.mrf.mxu0 }
 0x158   : > { %v1033_v34 = vadd.f32 %v3683_v40, %v1032_v42 }
 0x159   : > { %1571 = vmatmul.f32.gmra.mxu0 %v1074_v41  ;;  %1664 = vmatmul.f32.gmra.mxu1 %v3351_v9 }
 0x15a   : > { %v1253_v51 = vpop.f32.mrf.mxu3  ;;  %v1210_v5 = vadd.f32 %v3716_v28, %v1033_v34 }
 0x15f   : > { %1347 = vmatmul.f32.gmra.mxu2 %v3365_v45  ;;  %1468 = vmatmul.f32.gmra.mxu3 %v1100_v46  ;;  %v3735_v45 = vpop.f32.mrf.mxu1 }
 0x161   : > { %1575 = vmatmul.f32.gmra.mxu0 %v3351_v9  ;;  %1668 = vmatmul.f32.gmra.mxu1 %v3347_v37  ;;  %v3733_v9 = vpop.f32.mrf.mxu0 }
 0x162   : > { %v1120_v58 = vpop.f32.mrf.mxu2  ;;  %v1041_v3 = vadd.f32 %v3683_v40, %v3733_v9 }
 0x163   : > { %v1121_v21 = vadd.f32 %v3683_v40, %v1120_v58 }
 0x164   : > { %v1214_v1 = vadd.f32 %v3726_v48, %v1041_v3 }
 0x165   : > { %v3724_v35 = vadd.f32 %v1253_v51, %v1121_v21 }
 0x167   : > { %1352 = vmatmul.f32.gmra.mxu2 %v3434_v24  ;;  %1474 = vmatmul.f32.gmra.mxu3 %v1108_v52  ;;  %v3747_v17 = vpop.f32.mrf.mxu1 }
 0x169   : > { %1579 = vmatmul.f32.gmra.mxu0 %v3347_v37  ;;  %1672 = vmatmul.f32.gmra.mxu1 %v3422_v19  ;;  %v3745_v56 = vpop.f32.mrf.mxu0 }
 0x16a   : > { %v1257_v52 = vpop.f32.mrf.mxu3  ;;  %v1049_v28 = vadd.f32 %v3683_v40, %v3745_v56 }
 0x16c   : > { %v1218_v9 = vadd.f32 %v3735_v45, %v1049_v28 }
 0x16f   : > { %1357 = vmatmul.f32.gmra.mxu2 %v3502_v30  ;;  %1480 = vmatmul.f32.gmra.mxu3 %v1116_v63 }
 0x171   : > { %1583 = vmatmul.f32.gmra.mxu0 %v3422_v19  ;;  %1676 = vmatmul.f32.gmra.mxu1 %v3493_v36  ;;  %v3754_v19 = vpop.f32.mrf.mxu0 }
 0x172   : > { %v1128_v24 = vpop.f32.mrf.mxu2 }
 0x173   : > { %v1129_v46 = vadd.f32 %v3683_v40, %v1128_v24 }
 0x175   : > { %v3743_v37 = vadd.f32 %v1257_v52, %v1129_v46 }
 0x176   : > { %v3756_v30 = vpop.f32.mrf.mxu1 }
 0x177   : > { %1362 = vmatmul.f32.gmra.mxu2 %v3558_v22  ;;  %1486 = vmatmul.f32.gmra.mxu3 %v1124_v55 }
 0x179   : > { %1587 = vmatmul.f32.gmra.mxu0 %v3493_v36  ;;  %1680 = vmatmul.f32.gmra.mxu1 %v3549_v33 }
 0x17a   : > { %v1261_v22 = vpop.f32.mrf.mxu3 }
 0x17e   : > { %v3766_v18 = vpop.f32.mrf.mxu0 }
 0x17f   : > { %1367 = vmatmul.f32.gmra.mxu2 %v3594_v6  ;;  %1492 = vmatmul.f32.gmra.mxu3 %v1132_v43 }
 0x181   : > { %1591 = vmatmul.f32.gmra.mxu0 %v3549_v33  ;;  %1684 = vmatmul.f32.gmra.mxu1 %v3586_v15 }
 0x182   : > { %v1136_v63 = vpop.f32.mrf.mxu2 }
 0x183   : > { %v1137_v55 = vadd.f32 %v3683_v40, %v1136_v63  ;;  %v1057_v63 = vadd.f32 %v3683_v40, %v3754_v19 }
 0x185   : > { %v3764_v36 = vadd.f32 %v1261_v22, %v1137_v55 }
 0x186   : > { %v3768_v0 = vpop.f32.mrf.mxu1 }
 0x187   : > { %1372 = vmatmul.f32.gmra.mxu2 %v3622_v59  ;;  %1498 = vmatmul.f32.gmra.mxu3 %v1140_v16  ;;  %v1025_v16 = vadd.f32 %v3683_v40, %v1024_v7 }
 0x189   : > { %1595 = vmatmul.f32.gmra.mxu0 %v3586_v15  ;;  %1688 = vmatmul.f32.gmra.mxu1 %v3615_v62  ;;  %v1206_v8 = vadd.f32 %v3710_v31, %v1025_v16 }
 0x18a   : > { %v1265_v33 = vpop.f32.mrf.mxu3 }
 0x18e   : > { %v3775_v6 = vpop.f32.mrf.mxu0  ;;  %v3777_v43 = vpop.f32.mrf.mxu1 }
 0x18f   : > { %1377 = vmatmul.f32.gmra.mxu2 %v3650_v60 }
 0x191   : > { %1599 = vmatmul.f32.gmra.mxu0 %v3615_v62  ;;  %1692 = vmatmul.f32.gmra.mxu1 %v3642_v10 }
 0x192   : > { %v1144_v26 = vpop.f32.mrf.mxu2  ;;  %v1409_v59 = vpop.f32.mrf.mxu3 }
 0x193   : > { %v1145_v54 = vadd.f32 %v3683_v40, %v1144_v26 }
 0x195   : > { %v3784_v15 = vadd.f32 %v1265_v33, %v1145_v54 }
 0x196   : > { %v3786_v27 = vpop.f32.mrf.mxu0  ;;  %v1633_v11 = vpop.f32.mrf.mxu1 }
 0x199   : > { %1603 = vmatmul.f32.gmra.mxu0 %v3642_v10 }
 0x19a   : > { %v1303_v60 = vpop.f32.mrf.mxu2  ;;  %v1415_v12 = vpop.f32.mrf.mxu3 }
 0x19b   : > { %v1304_v62 = vadd.f32 %v1303_v60, %v1206_v8  ;;  %v1065_v60 = vadd.f32 %v3683_v40, %v3766_v18 }
 0x19d   : > { %v1410_v32 = vadd.f32 %v1409_v59, %v1304_v62  ;;  %v1222_v59 = vadd.f32 %v3747_v17, %v1057_v63 }
 0x19e   : > { %v1544_v41 = vpop.f32.mrf.mxu0  ;;  %v1637_v47 = vpop.f32.mrf.mxu1 }
 0x19f   : > { %v1545_v49 = vadd.f32 %v1544_v41, %v1410_v32  ;;  %v1226_v32 = vadd.f32 %v3756_v30, %v1065_v60 }
 0x1a1   : > { %v3792_v25 = vadd.f32 %v1633_v11, %v1545_v49 }
 0x1a2   : > { %v1308_v61 = vpop.f32.mrf.mxu2  ;;  %v1421_v14 = vpop.f32.mrf.mxu3 }
 0x1a3   : > { %v1309_v2 = vadd.f32 %v1308_v61, %v1210_v5  ;;  %v1697_v10 = vsel %vm1696_vm11, %v3792_v25, 0.0  ;;  %v1073_v61 = vadd.f32 %v3683_v40, %v3775_v6 }
 0x1a4   : > { %1698 = vadd.xlane.f32.xlu0 %v1697_v10 }
 0x1a5   : > { %v1416_v13 = vadd.f32 %v1415_v12, %v1309_v2  ;;  %v1230_v3 = vadd.f32 %v3768_v0, %v1073_v61 }
 0x1a6   : > { %v1548_v4 = vpop.f32.mrf.mxu0  ;;  %v1641_v50 = vpop.f32.mrf.mxu1 }
 0x1a7   : > { %v1549_v20 = vadd.f32 %v1548_v4, %v1416_v13 }
 0x1a9   : > { %v3799_v53 = vadd.f32 %v1637_v47, %v1549_v20 }
 0x1aa   : > { %v1313_v44 = vpop.f32.mrf.mxu2  ;;  %v1427_v39 = vpop.f32.mrf.mxu3 }
 0x1ab   : > { %v1314_v31 = vadd.f32 %v1313_v44, %v1214_v1  ;;  %v1700_v7 = vsel %vm1696_vm11, %v3799_v53, 0.0  ;;  %v1081_v1 = vadd.f32 %v3683_v40, %v3786_v27 }
 0x1ac   : > { %1701 = vadd.xlane.f32.xlu1 %v1700_v7 }
 0x1ad   : > { %v1422_v58 = vadd.f32 %v1421_v14, %v1314_v31  ;;  %v1234_v7 = vadd.f32 %v3777_v43, %v1081_v1 }
 0x1ae   : > { %v1552_v21 = vpop.f32.mrf.mxu0  ;;  %v1645_v51 = vpop.f32.mrf.mxu1 }
 0x1af   : > { %v1553_v42 = vadd.f32 %v1552_v21, %v1422_v58 }
 0x1b1   : > { %v3806_v24 = vadd.f32 %v1641_v50, %v1553_v42 }
 0x1b2   : > { %v1318_v48 = vpop.f32.mrf.mxu2  ;;  %v1433_v46 = vpop.f32.mrf.mxu3 }
 0x1b3   : > { %v1319_v52 = vadd.f32 %v1318_v48, %v1218_v9  ;;  %v1703_v22 = vsel %vm1696_vm11, %v3806_v24, 0.0 }
 0x1b4   : > { %1704 = vadd.xlane.f32.xlu2 %v1703_v22 }
 0x1b5   : > { %v1428_v55 = vadd.f32 %v1427_v39, %v1319_v52 }
 0x1b6   : > { %v1556_v56 = vpop.f32.mrf.mxu0  ;;  %v1649_v33 = vpop.f32.mrf.mxu1 }
 0x1b7   : > { %v1557_v26 = vadd.f32 %v1556_v56, %v1428_v55 }
 0x1b9   : > { %v3813_v54 = vadd.f32 %v1645_v51, %v1557_v26 }
 0x1ba   : > { %v1323_v45 = vpop.f32.mrf.mxu2  ;;  %v1439_v16 = vpop.f32.mrf.mxu3 }
 0x1bb   : > { %v1324_v11 = vadd.f32 %v1323_v45, %v1222_v59  ;;  %v1706_v8 = vsel %vm1696_vm11, %v3813_v54, 0.0 }
 0x1bc   : > { %1707 = vadd.xlane.f32.xlu2 %v1706_v8 }
 0x1bd   : > { %v1434_v12 = vadd.f32 %v1433_v46, %v1324_v11 }
 0x1be   : > { %v1560_v19 = vpop.f32.mrf.mxu0  ;;  %v1653_v62 = vpop.f32.mrf.mxu1 }
 0x1bf   : > { %v1561_v34 = vadd.f32 %v1560_v19, %v1434_v12 }
 0x1c1   : > { %v3820_v41 = vadd.f32 %v1649_v33, %v1561_v34 }
 0x1c2   : > { %v1328_v17 = vpop.f32.mrf.mxu2  ;;  %v1445_v47 = vpop.f32.mrf.mxu3 }
 0x1c3   : > { %v1329_v49 = vadd.f32 %v1328_v17, %v1226_v32  ;;  %v1709_v5 = vsel %vm1696_vm11, %v3820_v41, 0.0 }
 0x1c4   : > { %1710 = vadd.xlane.f32.xlu0 %v1709_v5 }
 0x1c5   : > { %v1440_v14 = vadd.f32 %v1439_v16, %v1329_v49 }
 0x1c6   : > { %v1564_v18 = vpop.f32.mrf.mxu0  ;;  %v1657_v2 = vpop.f32.mrf.mxu1 }
 0x1c7   : > { %v1565_v10 = vadd.f32 %v1564_v18, %v1440_v14 }
 0x1c9   : > { %v3827_v13 = vadd.f32 %v1653_v62, %v1565_v10 }
 0x1ca   : > { %v1333_v30 = vpop.f32.mrf.mxu2  ;;  %v1451_v4 = vpop.f32.mrf.mxu3 }
 0x1cb   : > { %v1334_v50 = vadd.f32 %v1333_v30, %v1230_v3  ;;  %v1712_v20 = vsel %vm1696_vm11, %v3827_v13, 0.0 }
 0x1cc   : > { %1713 = vadd.xlane.f32.xlu1 %v1712_v20 }
 0x1cd   : > { %v1446_v44 = vadd.f32 %v1445_v47, %v1334_v50 }
 0x1ce   : > { %v1568_v6 = vpop.f32.mrf.mxu0  ;;  %v1661_v39 = vpop.f32.mrf.mxu1 }
 0x1cf   : > { %v1569_v31 = vadd.f32 %v1568_v6, %v1446_v44 }
 0x1d1   : > { %v3834_v28 = vadd.f32 %v1657_v2, %v1569_v31 }
 0x1d2   : > { %v1338_v0 = vpop.f32.mrf.mxu2  ;;  %v1457_v58 = vpop.f32.mrf.mxu3 }
 0x1d3   : > { %v1339_v21 = vadd.f32 %v1338_v0, %v1234_v7  ;;  %v1715_v51 = vsel %vm1696_vm11, %v3834_v28, 0.0 }
 0x1d4   : > { %1716 = vadd.xlane.f32.xlu2 %v1715_v51 }
 0x1d5   : > { %v1452_v42 = vadd.f32 %v1451_v4, %v1339_v21 }
 0x1d6   : > { %v1572_v9 = vpop.f32.mrf.mxu0  ;;  %v1665_v48 = vpop.f32.mrf.mxu1 }
 0x1d7   : > { %v1573_v46 = vadd.f32 %v1572_v9, %v1452_v42 }
 0x1d9   : > { %v3838_v40 = vadd.f32 %v1661_v39, %v1573_v46 }
 0x1da   : > { %v1343_v27 = vpop.f32.mrf.mxu2  ;;  %v1463_v52 = vpop.f32.mrf.mxu3 }
 0x1db   : > { %v1344_v22 = vadd.f32 %v1343_v27, %v3686_v57  ;;  %v1718_v43 = vsel %vm1696_vm11, %v3838_v40, 0.0 }
 0x1dc   : > { %1719 = vadd.xlane.f32.xlu0 %v1718_v43 }
 0x1dd   : > { %v1458_v63 = vadd.f32 %v1457_v58, %v1344_v22 }
 0x1de   : > { %v1576_v55 = vpop.f32.mrf.mxu0  ;;  %v1669_v56 = vpop.f32.mrf.mxu1 }
 0x1df   : > { %v1577_v33 = vadd.f32 %v1576_v55, %v1458_v63 }
 0x1e1   : > { %v3843_v26 = vadd.f32 %v1665_v48, %v1577_v33 }
 0x1e2   : > { %v1348_v59 = vpop.f32.mrf.mxu2  ;;  %v1469_v45 = vpop.f32.mrf.mxu3 }
 0x1e3   : > { %v1349_v16 = vadd.f32 %v1348_v59, %v3694_v29  ;;  %v1721_v11 = vsel %vm1696_vm11, %v3843_v26, 0.0 }
 0x1e4   : > { %1722 = vadd.xlane.f32.xlu1 %v1721_v11 }
 0x1e5   : > { %v1464_v8 = vadd.f32 %v1463_v52, %v1349_v16 }
 0x1e6   : > { %v1580_v57 = vpop.f32.mrf.mxu0  ;;  %v1673_v60 = vpop.f32.mrf.mxu1 }
 0x1e7   : > { %v1581_v12 = vadd.f32 %v1580_v57, %v1464_v8 }
 0x1e9   : > { %v3848_v19 = vadd.f32 %v1669_v56, %v1581_v12 }
 0x1ea   : > { %v1353_v62 = vpop.f32.mrf.mxu2  ;;  %v1475_v17 = vpop.f32.mrf.mxu3 }
 0x1eb   : > { %v1354_v34 = vadd.f32 %v1353_v62, %v3700_v38  ;;  %v1724_v32 = vsel %vm1696_vm11, %v3848_v19, 0.0 }
 0x1ec   : > { %1725 = vadd.xlane.f32.xlu2 %v1724_v32 }
 0x1ed   : > { %v1470_v47 = vadd.f32 %v1469_v45, %v1354_v34 }
 0x1ee   : > { %v1584_v29 = vpop.f32.mrf.mxu0  ;;  %v1677_v5 = vpop.f32.mrf.mxu1 }
 0x1ef   : > { %v1585_v49 = vadd.f32 %v1584_v29, %v1470_v47 }
 0x1f1   : > { %v3853_v61 = vadd.f32 %v1673_v60, %v1585_v49 }
 0x1f2   : > { %v1358_v14 = vpop.f32.mrf.mxu2  ;;  %v1481_v38 = vpop.f32.mrf.mxu3 }
 0x1f3   : > { %v1359_v18 = vadd.f32 %v1358_v14, %v3708_v23  ;;  %v1727_v2 = vsel %vm1696_vm11, %v3853_v61, 0.0 }
 0x1f4   : > { %1728 = vadd.xlane.f32.xlu0 %v1727_v2 }
 0x1f5   : > { %v1476_v10 = vadd.f32 %v1475_v17, %v1359_v18 }
 0x1f6   : > { %v1588_v3 = vpop.f32.mrf.mxu0  ;;  %v1681_v50 = vpop.f32.mrf.mxu1 }
 0x1f7   : > { %v1589_v30 = vadd.f32 %v1588_v3, %v1476_v10 }
 0x1f9   : > { %v3858_v4 = vadd.f32 %v1677_v5, %v1589_v30 }
 0x1fa   : > { %v1363_v20 = vpop.f32.mrf.mxu2  ;;  %v1487_v31 = vpop.f32.mrf.mxu3 }
 0x1fb   : > { %v1364_v1 = vadd.f32 %v1363_v20, %v3724_v35  ;;  %v1730_v44 = vsel %vm1696_vm11, %v3858_v4, 0.0 }
 0x1fc   : > { %1731 = vadd.xlane.f32.xlu1 %v1730_v44 }
 0x1fd   : > { %v1482_v6 = vadd.f32 %v1481_v38, %v1364_v1 }
 0x1fe   : > { %v1592_v23 = vpop.f32.mrf.mxu0  ;;  %v1685_v51 = vpop.f32.mrf.mxu1 }
 0x1ff   : > { %v1593_v39 = vadd.f32 %v1592_v23, %v1482_v6 }
 0x201   : > { %v3863_v7 = vadd.f32 %v1681_v50, %v1593_v39 }
 0x202   : > { %v1368_v0 = vpop.f32.mrf.mxu2  ;;  %v1493_v46 = vpop.f32.mrf.mxu3 }
 0x203   : > { %v1369_v58 = vadd.f32 %v1368_v0, %v3743_v37  ;;  %v1733_v21 = vsel %vm1696_vm11, %v3863_v7, 0.0 }
 0x204   : > { %1734 = vadd.xlane.f32.xlu2 %v1733_v21 }
 0x205   : > { %v1488_v42 = vadd.f32 %v1487_v31, %v1369_v58 }
 0x206   : > { %v1596_v35 = vpop.f32.mrf.mxu0  ;;  %v1689_v37 = vpop.f32.mrf.mxu1 }
 0x207   : > { %v1597_v9 = vadd.f32 %v1596_v35, %v1488_v42 }
 0x209   : > { %v3868_v48 = vadd.f32 %v1685_v51, %v1597_v9 }
 0x20a   : > { %v1373_v27 = vpop.f32.mrf.mxu2  ;;  %v1499_v16 = vpop.f32.mrf.mxu3 }
 0x20b   : > { %v1374_v52 = vadd.f32 %v1373_v27, %v3764_v36  ;;  %v1736_v22 = vsel %vm1696_vm11, %v3868_v48, 0.0 }
 0x20c   : > { %1737 = vadd.xlane.f32.xlu0 %v1736_v22 }
 0x20d   : > { %v1494_v43 = vadd.f32 %v1493_v46, %v1374_v52 }
 0x20e   : > { %v1600_v63 = vpop.f32.mrf.mxu0  ;;  %v1693_v60 = vpop.f32.mrf.mxu1 }
 0x20f   : > { %v1601_v55 = vadd.f32 %v1600_v63, %v1494_v43 }
 0x211   : > { %v3873_v56 = vadd.f32 %v1689_v37, %v1601_v55 }
 0x212   : > { %v1378_v33 = vpop.f32.mrf.mxu2 }
 0x213   : > { %v1379_v59 = vadd.f32 %v1378_v33, %v3784_v15  ;;  %v1739_v45 = vsel %vm1696_vm11, %v3873_v56, 0.0 }
 0x214   : > { %1740 = vadd.xlane.f32.xlu1 %v1739_v45 }
 0x215   : > { %v1500_v11 = vadd.f32 %v1499_v16, %v1379_v59 }
 0x216   : > { %v1604_v36 = vpop.f32.mrf.mxu0 }
 0x217   : > { %v1605_v8 = vadd.f32 %v1604_v36, %v1500_v11  ;;  %v1699_v57 = vpop.xlane.xlu0 %1698 }
 0x218   : > { %v1745_v12 = vmul.f32 0.03125, %v1699_v57 }
 0x219   : > { %v3878_v62 = vadd.f32 %v1693_v60, %v1605_v8 }
 0x21a   : > { %v3881_v34 = vsub.f32 %v3792_v25, %v1745_v12 }
 0x21b   : > { %v1742_v32 = vsel %vm1696_vm11, %v3878_v62, 0.0 }
 0x21c   : > { %1743 = vadd.xlane.f32.xlu2 %v1742_v32  ;;  %v1777_v15 = vmul.f32 %v3881_v34, %v3881_v34 }
 0x21e   : > { %v1793_v17 = vsel %vm1696_vm11, %v1777_v15, 0.0 }
 0x21f   : > { %v1702_v47 = vpop.xlane.xlu1 %1701  ;;  %1794 = vadd.xlane.f32.xlu0 %v1793_v17 }
 0x220   : > { %v1746_v29 = vmul.f32 0.03125, %v1702_v47 }
 0x222   : > { %v3889_v49 = vsub.f32 %v3799_v53, %v1746_v29 }
 0x224   : > { %v1778_v5 = vmul.f32 %v3889_v49, %v3889_v49 }
 0x226   : > { %v1796_v25 = vsel %vm1696_vm11, %v1778_v5, 0.0 }
 0x227   : > { %v1705_v14 = vpop.xlane.xlu2 %1704  ;;  %1797 = vadd.xlane.f32.xlu1 %v1796_v25 }
 0x228   : > { %v1747_v18 = vmul.f32 0.03125, %v1705_v14 }
 0x22a   : > { %v3895_v2 = vsub.f32 %v3806_v24, %v1747_v18 }
 0x22c   : > { %v1779_v10 = vmul.f32 %v3895_v2, %v3895_v2 }
 0x22e   : > { %v1799_v38 = vsel %vm1696_vm11, %v1779_v10, 0.0 }
 0x22f   : > { %1800 = vadd.xlane.f32.xlu2 %v1799_v38  ;;  %v1708_v3 = vpop.xlane.xlu2 %1707 }
 0x230   : > { %v1748_v53 = vmul.f32 0.03125, %v1708_v3 }
 0x232   : > { %v3901_v30 = vsub.f32 %v3813_v54, %v1748_v53 }
 0x234   : > { %v1780_v50 = vmul.f32 %v3901_v30, %v3901_v30 }
 0x236   : > { %v1802_v20 = vsel %vm1696_vm11, %v1780_v50, 0.0 }
 0x237   : > { %1803 = vadd.xlane.f32.xlu0 %v1802_v20  ;;  %v1711_v1 = vpop.xlane.xlu0 %1710 }
 0x238   : > { %v1749_v24 = vmul.f32 0.03125, %v1711_v1 }
 0x23a   : > { %v3907_v44 = vsub.f32 %v3820_v41, %v1749_v24 }
 0x23c   : > { %v1781_v6 = vmul.f32 %v3907_v44, %v3907_v44 }
 0x23e   : > { %v1805_v23 = vsel %vm1696_vm11, %v1781_v6, 0.0 }
 0x23f   : > { %v1714_v39 = vpop.xlane.xlu1 %1713  ;;  %1806 = vadd.xlane.f32.xlu1 %v1805_v23 }
 0x240   : > { %v1750_v54 = vmul.f32 0.03125, %v1714_v39 }
 0x242   : > { %v3913_v31 = vsub.f32 %v3827_v13, %v1750_v54 }
 0x244   : > { %v1782_v0 = vmul.f32 %v3913_v31, %v3913_v31 }
 0x246   : > { %v1808_v58 = vsel %vm1696_vm11, %v1782_v0, 0.0 }
 0x247   : > { %v1717_v21 = vpop.xlane.xlu2 %1716  ;;  %1809 = vadd.xlane.f32.xlu2 %v1808_v58 }
 0x248   : > { %v1751_v41 = vmul.f32 0.03125, %v1717_v21 }
 0x24a   : > { %v3919_v51 = vsub.f32 %v3834_v28, %v1751_v41 }
 0x24c   : > { %v1783_v42 = vmul.f32 %v3919_v51, %v3919_v51 }
 0x24e   : > { %v1811_v35 = vsel %vm1696_vm11, %v1783_v42, 0.0 }
 0x24f   : > { %1812 = vadd.xlane.f32.xlu0 %v1811_v35  ;;  %v1720_v9 = vpop.xlane.xlu0 %1719 }
 0x250   : > { %v1752_v13 = vmul.f32 0.03125, %v1720_v9 }
 0x252   : > { %v3925_v46 = vsub.f32 %v3838_v40, %v1752_v13 }
 0x254   : > { %v1784_v27 = vmul.f32 %v3925_v46, %v3925_v46 }
 0x256   : > { %v1814_v52 = vsel %vm1696_vm11, %v1784_v27, 0.0 }
 0x257   : > { %v1723_v22 = vpop.xlane.xlu1 %1722  ;;  %1815 = vadd.xlane.f32.xlu1 %v1814_v52 }
 0x258   : > { %v1753_v28 = vmul.f32 0.03125, %v1723_v22 }
 0x25a   : > { %v3931_v43 = vsub.f32 %v3843_v26, %v1753_v28  ;;  %v3981_v28 = vld [vmem:[%s4385_s4] ss:$0 sm:$0xff] }
 0x25c   : > { %v1785_v37 = vmul.f32 %v3931_v43, %v3931_v43 }
 0x25e   : > { %v1817_v63 = vsel %vm1696_vm11, %v1785_v37, 0.0 }
 0x25f   : > { %v1726_v55 = vpop.xlane.xlu2 %1725  ;;  %1818 = vadd.xlane.f32.xlu2 %v1817_v63 }
 0x260   : > { %v1754_v40 = vmul.f32 0.03125, %v1726_v55  ;;  %v3986_v55 = vld [vmem:[%s4386_s5] ss:$0 sm:$0xff] }
 0x262   : > { %v3937_v33 = vsub.f32 %v3848_v19, %v1754_v40 }
 0x264   : > { %v1786_v59 = vmul.f32 %v3937_v33, %v3937_v33 }
 0x266   : > { %v1820_v45 = vsel %vm1696_vm11, %v1786_v59, 0.0 }
 0x267   : > { %1821 = vadd.xlane.f32.xlu0 %v1820_v45  ;;  %v1729_v16 = vpop.xlane.xlu0 %1728 }
 0x268   : > { %v1755_v26 = vmul.f32 0.03125, %v1729_v16 }
 0x26a   : > { %v3943_v11 = vsub.f32 %v3853_v61, %v1755_v26 }
 0x26c   : > { %v1787_v36 = vmul.f32 %v3943_v11, %v3943_v11 }
 0x26e   : > { %v1823_v8 = vsel %vm1696_vm11, %v1787_v36, 0.0 }
 0x26f   : > { %v1732_v57 = vpop.xlane.xlu1 %1731  ;;  %1824 = vadd.xlane.f32.xlu1 %v1823_v8 }
 0x270   : > { %v1756_v19 = vmul.f32 0.03125, %v1732_v57 }
 0x272   : > { %v3949_v60 = vsub.f32 %v3858_v4, %v1756_v19 }
 0x274   : > { %v1788_v12 = vmul.f32 %v3949_v60, %v3949_v60 }
 0x276   : > { %v1826_v32 = vsel %vm1696_vm11, %v1788_v12, 0.0 }
 0x277   : > { %v1735_v15 = vpop.xlane.xlu2 %1734  ;;  %1827 = vadd.xlane.f32.xlu2 %v1826_v32 }
 0x278   : > { %v1757_v61 = vmul.f32 0.03125, %v1735_v15 }
 0x27a   : > { %v3955_v17 = vsub.f32 %v3863_v7, %v1757_v61 }
 0x27c   : > { %v1789_v47 = vmul.f32 %v3955_v17, %v3955_v17 }
 0x27e   : > { %v1829_v29 = vsel %vm1696_vm11, %v1789_v47, 0.0 }
 0x27f   : > { %1830 = vadd.xlane.f32.xlu0 %v1829_v29  ;;  %v1738_v5 = vpop.xlane.xlu0 %1737 }
 0x280   : > { %v1758_v4 = vmul.f32 0.03125, %v1738_v5 }
 0x282   : > { %v3961_v25 = vsub.f32 %v3868_v48, %v1758_v4 }
 0x284   : > { %v1790_v14 = vmul.f32 %v3961_v25, %v3961_v25 }
 0x286   : > { %v1832_v18 = vsel %vm1696_vm11, %v1790_v14, 0.0 }
 0x287   : > { %v1741_v10 = vpop.xlane.xlu1 %1740  ;;  %1833 = vadd.xlane.f32.xlu1 %v1832_v18 }
 0x288   : > { %v1759_v7 = vmul.f32 0.03125, %v1741_v10 }
 0x28a   : > { %v3967_v38 = vsub.f32 %v3873_v56, %v1759_v7 }
 0x28c   : > { %v1791_v3 = vmul.f32 %v3967_v38, %v3967_v38 }
 0x28e   : > { %v1835_v53 = vsel %vm1696_vm11, %v1791_v3, 0.0 }
 0x28f   : > { %v1744_v50 = vpop.xlane.xlu2 %1743  ;;  %1836 = vadd.xlane.f32.xlu2 %v1835_v53 }
 0x290   : > { %v1760_v48 = vmul.f32 0.03125, %v1744_v50 }
 0x292   : > { %v3973_v20 = vsub.f32 %v3878_v62, %v1760_v48  ;;  %v1795_v1 = vpop.xlane.xlu0 %1794 }
 0x293   : > { %v1841_v24 = vmul.f32 0.03125, %v1795_v1 }
 0x294   : > { %v1792_v6 = vmul.f32 %v3973_v20, %v3973_v20 }
 0x295   : > { %v1857_v23 = vadd.f32 1e-05, %v1841_v24 }
 0x296   : > { %v1838_v56 = vsel %vm1696_vm11, %v1792_v6, 0.0 }
 0x297   : > { %2596 = vrsqrt.f32 %v1857_v23  ;;  %1839 = vadd.xlane.f32.xlu0 %v1838_v56  ;;  %vm1879_vm6 = vweird.f32 %v1857_v23 }
 0x29a   : > { %v1798_v39 = vpop.xlane.xlu1 %1797 }
 0x29b   : > { %v1842_v54 = vmul.f32 0.03125, %v1798_v39 }
 0x29d   : > { %v2597_v0 = vpop.eup %2596  ;;  %v1858_v58 = vadd.f32 1e-05, %v1842_v54 }
 0x29e   : > { %v1874_v21 = vmul.f32 %v2597_v0, %v1857_v23  ;;  %vm1880_vm13 = vweird.f32 %v2597_v0 }
 0x29f   : > { %2598 = vrsqrt.f32 %v1858_v58  ;;  %vm1881_vm0 = vmor %vm1879_vm6, %vm1880_vm13  ;;  %vm1889_vm7 = vweird.f32 %v1858_v58 }
 0x2a0   : > { %v1875_v41 = vmul.f32 %v2597_v0, %v1874_v21 }
 0x2a2   : > { %v1876_v42 = vmul.f32 0.5, %v1875_v41  ;;  %v1801_v62 = vpop.xlane.xlu2 %1800 }
 0x2a3   : > { %v1843_v35 = vmul.f32 0.03125, %v1801_v62 }
 0x2a4   : > { %v1877_v9 = vsub.f32 1.5, %v1876_v42 }
 0x2a5   : > { %v2599_v13 = vpop.eup %2598  ;;  %v1859_v27 = vadd.f32 1e-05, %v1843_v35 }
 0x2a6   : > { %v1878_v52 = vmul.f32 %v2597_v0, %v1877_v9  ;;  %v1884_v22 = vmul.f32 %v2599_v13, %v1858_v58  ;;  %vm1890_vm2 = vweird.f32 %v2599_v13 }
 0x2a7   : > { %2600 = vrsqrt.f32 %v1859_v27  ;;  %vm1891_vm8 = vmor %vm1889_vm7, %vm1890_vm2  ;;  %vm1899_vm10 = vweird.f32 %v1859_v27 }
 0x2a8   : > { %v1882_v37 = vsel %vm1881_vm0, %v2597_v0, %v1878_v52  ;;  %v1885_v63 = vmul.f32 %v2599_v13, %v1884_v22 }
 0x2a9   : > { %v2033_v40 = vmul.f32 %v1882_v37, %v3881_v34 }
 0x2aa   : > { %v1886_v59 = vmul.f32 0.5, %v1885_v63  ;;  %v1804_v45 = vpop.xlane.xlu0 %1803 }
 0x2ab   : > { %v2053_v16 = vmul.f32 %v3981_v28, %v2033_v40  ;;  %v1844_v26 = vmul.f32 0.03125, %v1804_v45 }
 0x2ac   : > { %v1887_v36 = vsub.f32 1.5, %v1886_v59 }
 0x2ad   : > { %v2601_v8 = vpop.eup %2600  ;;  %v3991_v57 = vadd.f32 %v3986_v55, %v2053_v16  ;;  %v1860_v19 = vadd.f32 1e-05, %v1844_v26 }
 0x2ae   : > { %v1888_v12 = vmul.f32 %v2599_v13, %v1887_v36  ;;  %v1894_v32 = vmul.f32 %v2601_v8, %v1859_v27  ;;  %vm1900_vm9 = vweird.f32 %v2601_v8 }
 0x2af   : > { %v2089_v15 = vsub.f32 0.0, %v3991_v57  ;;  %2602 = vrsqrt.f32 %v1860_v19  ;;  %vm1901_vm12 = vmor %vm1899_vm10, %vm1900_vm9  ;;  %vm1909_vm15 = vweird.f32 %v1860_v19 }
 0x2b0   : > { %v1892_v34 = vsel %vm1891_vm8, %v2599_v13, %v1888_v12  ;;  %v1895_v61 = vmul.f32 %v2601_v8, %v1894_v32 }
 0x2b1   : > { %v2105_v47 = vmul.f32 1.442695, %v2089_v15  ;;  %v2034_v29 = vmul.f32 %v1892_v34, %v3889_v49 }
 0x2b2   : > { %v1896_v5 = vmul.f32 0.5, %v1895_v61  ;;  %v1807_v4 = vpop.xlane.xlu1 %1806 }
 0x2b3   : > { %2604 = vpow2.f32 %v2105_v47  ;;  %v2054_v14 = vmul.f32 %v3981_v28, %v2034_v29  ;;  %v1845_v18 = vmul.f32 0.03125, %v1807_v4 }
 0x2b4   : > { %v1897_v10 = vsub.f32 1.5, %v1896_v5 }
 0x2b5   : > { %v2603_v7 = vpop.eup %2602  ;;  %v3997_v3 = vadd.f32 %v3986_v55, %v2054_v14  ;;  %v1861_v53 = vadd.f32 1e-05, %v1845_v18 }
 0x2b6   : > { %v1898_v50 = vmul.f32 %v2601_v8, %v1897_v10  ;;  %v1904_v48 = vmul.f32 %v2603_v7, %v1860_v19  ;;  %vm1910_vm14 = vweird.f32 %v2603_v7 }
 0x2b7   : > { %v2090_v1 = vsub.f32 0.0, %v3997_v3  ;;  %2606 = vrsqrt.f32 %v1861_v53  ;;  %vm1911_vm1 = vmor %vm1909_vm15, %vm1910_vm14  ;;  %vm1919_vm3 = vweird.f32 %v1861_v53 }
 0x2b8   : > { %v1902_v49 = vsel %vm1901_vm12, %v2601_v8, %v1898_v50  ;;  %v1905_v24 = vmul.f32 %v2603_v7, %v1904_v48 }
 0x2b9   : > { %v2605_v6 = vpop.eup %2604  ;;  %v2107_v23 = vmul.f32 1.442695, %v2090_v1  ;;  %v2035_v56 = vmul.f32 %v1902_v49, %v3895_v2 }
 0x2ba   : > { %v2137_v39 = vadd.f32 1.0, %v2605_v6  ;;  %v1906_v54 = vmul.f32 0.5, %v1905_v24  ;;  %v1810_v0 = vpop.xlane.xlu2 %1809 }
 0x2bb   : > { %2608 = vpow2.f32 %v2107_v23  ;;  %v2055_v58 = vmul.f32 %v3981_v28, %v2035_v56  ;;  %v1846_v21 = vmul.f32 0.03125, %v1810_v0 }
 0x2bc   : > { %2610 = vrcp.f32 %v2137_v39  ;;  %v1907_v62 = vsub.f32 1.5, %v1906_v54  ;;  %v2162_v34 = vand.u32 2147483647, %v2137_v39  ;;  %vm2158_vm6 = vweird.f32 %v2137_v39 }
 0x2bd   : > { %v2607_v41 = vpop.eup %2606  ;;  %v4003_v42 = vadd.f32 %v3986_v55, %v2055_v58  ;;  %v4005_v35 = vadd.f32 1e-05, %v1846_v21 }
 0x2be   : > { %v1914_v9 = vmul.f32 %v2607_v41, %v1861_v53  ;;  %v1908_v2 = vmul.f32 %v2603_v7, %v1907_v62  ;;  %vm1920_vm4 = vweird.f32 %v2607_v41  ;;  %vm2163_vm2 = vcmp.eq.f32.partialorder %v2162_v34, 8.507059e+37 }
 0x2bf   : > { %v2091_v13 = vsub.f32 0.0, %v4003_v42  ;;  %2612 = vrsqrt.f32 %v4005_v35  ;;  %vm1921_vm13 = vmor %vm1919_vm3, %vm1920_vm4  ;;  %vm1929_vm9 = vweird.f32 %v4005_v35 }
 0x2c0   : > { %v1915_v27 = vmul.f32 %v2607_v41, %v1914_v9  ;;  %v1912_v37 = vsel %vm1911_vm1, %v2603_v7, %v1908_v2 }
 0x2c1   : > { %v2609_v52 = vpop.eup %2608  ;;  %v2109_v22 = vmul.f32 1.442695, %v2091_v13  ;;  %v2036_v59 = vmul.f32 %v1912_v37, %v3901_v30  ;;  %v2164_v30 = vand.u32 2147483648, %v2137_v39 }
 0x2c2   : > { %v2611_v63 = vpop.eup %2610  ;;  %v4009_v40 = vadd.f32 1.0, %v2609_v52  ;;  %v1916_v45 = vmul.f32 0.5, %v1915_v27  ;;  %v1813_v16 = vpop.xlane.xlu0 %1812 }
 0x2c3   : > { %v2154_v26 = vmul.f32 %v2611_v63, %v2137_v39  ;;  %2614 = vpow2.f32 %v2109_v22  ;;  %v1847_v36 = vmul.f32 0.03125, %v1813_v16  ;;  %v2056_v12 = vmul.f32 %v3981_v28, %v2036_v59 }
 0x2c4   : > { %2616 = vrcp.f32 %v4009_v40  ;;  %v1917_v32 = vsub.f32 1.5, %v1916_v45  ;;  %vm2159_vm5 = vweird.f32 %v2611_v63  ;;  %v2165_v48 = vor.u32 1.1754944e-38, %v2164_v30 }
 0x2c5   : > { %v4013_v8 = vpop.eup %2612  ;;  %v2155_v19 = vsub.f32 1.0, %v2154_v26  ;;  %v4016_v15 = vadd.f32 1e-05, %v1847_v36  ;;  %v4021_v29 = vadd.f32 %v3986_v55, %v2056_v12  ;;  %vm2160_vm0 = vmor %vm2158_vm6, %vm2159_vm5  ;;  %v2176_v39 = vand.u32 2147483647, %v4009_v40 }
 0x2c6   : > { %v1924_v61 = vmul.f32 %v4013_v8, %v4005_v35  ;;  %v1918_v5 = vmul.f32 %v2607_v41, %v1917_v32  ;;  %v2178_v21 = vand.u32 2147483648, %v4009_v40  ;;  %vm1930_vm7 = vweird.f32 %v4013_v8 }
 0x2c7   : > { %v2156_v47 = vmul.f32 %v2611_v63, %v2155_v19  ;;  %2618 = vrsqrt.f32 %v4016_v15  ;;  %v2092_v10 = vsub.f32 0.0, %v4021_v29  ;;  %vm2172_vm10 = vweird.f32 %v4009_v40  ;;  %vm1931_vm14 = vmor %vm1929_vm9, %vm1930_vm7 }
 0x2c8   : > { %v1925_v4 = vmul.f32 %v4013_v8, %v1924_v61  ;;  %v1922_v7 = vsel %vm1921_vm13, %v2607_v41, %v1918_v5  ;;  %vm2177_vm12 = vcmp.eq.f32.partialorder %v2176_v39, 8.507059e+37  ;;  %v2179_v37 = vor.u32 1.1754944e-38, %v2178_v21 }
 0x2c9   : > { %v2615_v14 = vpop.eup %2614  ;;  %v2157_v18 = vadd.f32 %v2611_v63, %v2156_v47  ;;  %v2037_v49 = vmul.f32 %v1922_v7, %v3907_v44  ;;  %v2111_v23 = vmul.f32 1.442695, %v2092_v10  ;;  %vm1939_vm1 = vweird.f32 %v4016_v15 }
 0x2ca   : > { %v2617_v50 = vpop.eup %2616  ;;  %v4028_v1 = vadd.f32 1.0, %v2615_v14  ;;  %v1926_v24 = vmul.f32 0.5, %v1925_v4  ;;  %v1816_v54 = vpop.xlane.xlu1 %1815 }
 0x2cb   : > { %v2161_v53 = vsel %vm2160_vm0, %v2611_v63, %v2157_v18  ;;  %v2168_v6 = vmul.f32 %v2617_v50, %v4009_v40  ;;  %v2057_v41 = vmul.f32 %v3981_v28, %v2037_v49  ;;  %vm2173_vm8 = vweird.f32 %v2617_v50 }
 0x2cc   : > { %v2166_v56 = vsel %vm2163_vm2, %v2165_v48, %v2161_v53  ;;  %2620 = vrcp.f32 %v4028_v1  ;;  %v1927_v62 = vsub.f32 1.5, %v1926_v24  ;;  %v1848_v2 = vmul.f32 0.03125, %v1816_v54  ;;  %vm2174_vm15 = vmor %vm2172_vm10, %vm2173_vm8 }
 0x2cd   : > { %v2619_v44 = vpop.eup %2618  ;;  %v2377_v0 = vmul.f32 %v2166_v56, %v3991_v57  ;;  %v2169_v58 = vsub.f32 1.0, %v2168_v6  ;;  %2622 = vpow2.f32 %v2111_v23  ;;  %v4051_v57 = vadd.f32 %v3986_v55, %v2057_v41 }
 0x2ce   : > { %v1934_v9 = vmul.f32 %v2619_v44, %v4016_v15  ;;  %v1928_v27 = vmul.f32 %v4013_v8, %v1927_v62  ;;  %v4054_v63 = vadd.f32 1e-05, %v1848_v2  ;;  %vm1940_vm3 = vweird.f32 %v2619_v44 }
 0x2cf   : > { %2393 = vst.msk [vmem:[%s4037_s16] sm:$0xff] %vm1696_vm11, %v2377_v0  ;;  %v2170_v13 = vmul.f32 %v2617_v50, %v2169_v58  ;;  %v2093_v45 = vsub.f32 0.0, %v4051_v57  ;;  %v2190_v4 = vand.u32 2147483647, %v4028_v1  ;;  %v2192_v14 = vand.u32 2147483648, %v4028_v1  ;;  %vm1941_vm5 = vmor %vm1939_vm1, %vm1940_vm3 }
 0x2d0   : > { %v1935_v52 = vmul.f32 %v2619_v44, %v1934_v9  ;;  %v1932_v35 = vsel %vm1931_vm14, %v4013_v8, %v1928_v27  ;;  %2624 = vrsqrt.f32 %v4054_v63  ;;  %vm2186_vm13 = vweird.f32 %v4028_v1 }
 0x2d1   : > { %v2171_v22 = vadd.f32 %v2617_v50, %v2170_v13  ;;  %v2038_v19 = vmul.f32 %v1932_v35, %v3913_v31  ;;  %v2113_v34 = vmul.f32 1.442695, %v2093_v45  ;;  %v2193_v49 = vor.u32 1.1754944e-38, %v2192_v14 }
 0x2d2   : > { %v2621_v59 = vpop.eup %2620  ;;  %v1936_v16 = vmul.f32 0.5, %v1935_v52  ;;  %v1819_v5 = vpop.xlane.xlu2 %1818  ;;  %vm2191_vm0 = vcmp.eq.f32.partialorder %v2190_v4, 8.507059e+37  ;;  %vm1949_vm10 = vweird.f32 %v4054_v63 }
 0x2d3   : > { %v2623_v40 = vpop.eup %2622  ;;  %v2175_v26 = vsel %vm2174_vm15, %v2617_v50, %v2171_v22  ;;  %v2182_v36 = vmul.f32 %v2621_v59, %v4028_v1  ;;  %v2058_v8 = vmul.f32 %v3981_v28, %v2038_v19  ;;  %vm2187_vm4 = vweird.f32 %v2621_v59 }
 0x2d4   : > { %v2180_v12 = vsel %vm2177_vm12, %v2179_v37, %v2175_v26  ;;  %v4061_v32 = vadd.f32 1.0, %v2623_v40  ;;  %v1937_v30 = vsub.f32 1.5, %v1936_v16  ;;  %v1849_v10 = vmul.f32 0.03125, %v1819_v5  ;;  %vm2188_vm6 = vmor %vm2186_vm13, %vm2187_vm4 }
 0x2d5   : > { %v2378_v61 = vmul.f32 %v2180_v12, %v3997_v3  ;;  %v2183_v47 = vsub.f32 1.0, %v2182_v36  ;;  %v4072_v18 = vadd.f32 %v3986_v55, %v2058_v8 }
 0x2d6   : > { %2626 = vrcp.f32 %v4061_v32  ;;  %v1938_v3 = vmul.f32 %v2619_v44, %v1937_v30  ;;  %v4081_v53 = vadd.f32 1e-05, %v1849_v10  ;;  %v2625_v23 = vpop.eup %2624  ;;  %v2204_v41 = vand.u32 2147483647, %v4061_v32 }
 0x2d7   : > { %2394 = vst.msk [vmem:[%s4037_s16 + $0x8] sm:$0xff] %vm1696_vm11, %v2378_v61  ;;  %v2184_v31 = vmul.f32 %v2621_v59, %v2183_v47  ;;  %2628 = vpow2.f32 %v2113_v34  ;;  %v2094_v50 = vsub.f32 0.0, %v4072_v18  ;;  %v2206_v27 = vand.u32 2147483648, %v4061_v32 }
 0x2d8   : > { %v1942_v48 = vsel %vm1941_vm5, %v2619_v44, %v1938_v3  ;;  %v1944_v44 = vmul.f32 %v2625_v23, %v4054_v63  ;;  %vm2200_vm7 = vweird.f32 %v4061_v32  ;;  %vm4103_vm8 = vcmp.eq.f32.partialorder %v2204_v41, 8.507059e+37 }
 0x2d9   : > { %v2185_v7 = vadd.f32 %v2621_v59, %v2184_v31  ;;  %v2039_v24 = vmul.f32 %v1942_v48, %v3919_v51  ;;  %v2115_v15 = vmul.f32 1.442695, %v2094_v50  ;;  %v2207_v16 = vor.u32 1.1754944e-38, %v2206_v27 }
 0x2da   : > { %v1822_v6 = vpop.xlane.xlu0 %1821  ;;  %v1945_v13 = vmul.f32 %v2625_v23, %v1944_v44  ;;  %vm1950_vm12 = vweird.f32 %v2625_v23  ;;  %vm1959_vm15 = vweird.f32 %v4081_v53 }
 0x2db   : > { %v2189_v56 = vsel %vm2188_vm6, %v2621_v59, %v2185_v7  ;;  %v1850_v39 = vmul.f32 0.03125, %v1822_v6  ;;  %v2059_v1 = vmul.f32 %v3981_v28, %v2039_v24  ;;  %2630 = vpow2.f32 %v2115_v15  ;;  %vm1951_vm14 = vmor %vm1949_vm10, %vm1950_vm12 }
 0x2dc   : > { %v2627_v54 = vpop.eup %2626  ;;  %v2194_v0 = vsel %vm2191_vm0, %v2193_v49, %v2189_v56  ;;  %2632 = vrsqrt.f32 %v4081_v53  ;;  %v1946_v37 = vmul.f32 0.5, %v1945_v13 }
 0x2dd   : > { %v2629_v58 = vpop.eup %2628  ;;  %v2379_v21 = vmul.f32 %v2194_v0, %v4003_v42  ;;  %v2196_v51 = vmul.f32 %v2627_v54, %v4061_v32  ;;  %v4091_v9 = vadd.f32 %v3986_v55, %v2059_v1  ;;  %v4097_v52 = vadd.f32 1e-05, %v1850_v39 }
 0x2de   : > { %v4088_v62 = vadd.f32 1.0, %v2629_v58  ;;  %vm2201_vm2 = vweird.f32 %v2627_v54  ;;  %v1947_v26 = vsub.f32 1.5, %v1946_v37 }
 0x2df   : > { %2395 = vst.msk [vmem:[%s4037_s16 + $0x10] sm:$0xff] %vm1696_vm11, %v2379_v21  ;;  %v2197_v2 = vsub.f32 1.0, %v2196_v51  ;;  %v2095_v22 = vsub.f32 0.0, %v4091_v9  ;;  %vm2202_vm9 = vmor %vm2200_vm7, %vm2201_vm2  ;;  %vm1969_vm5 = vweird.f32 %v4097_v52 }
 0x2e0   : > { %2634 = vrcp.f32 %v4088_v62  ;;  %v2218_v12 = vand.u32 2147483647, %v4088_v62  ;;  %v1948_v30 = vmul.f32 %v2625_v23, %v1947_v26  ;;  %v2220_v5 = vand.u32 2147483648, %v4088_v62 }
 0x2e1   : > { %v2198_v42 = vmul.f32 %v2627_v54, %v2197_v2  ;;  %2636 = vrsqrt.f32 %v4097_v52  ;;  %v2631_v45 = vpop.eup %2630  ;;  %v2117_v40 = vmul.f32 1.442695, %v2095_v22  ;;  %vm2214_vm1 = vweird.f32 %v4088_v62 }
 0x2e2   : > { %v1825_v36 = vpop.xlane.xlu1 %1824  ;;  %v4107_v19 = vpop.eup %2632  ;;  %v4111_v34 = vadd.f32 1.0, %v2631_v45  ;;  %v1952_v3 = vsel %vm1951_vm14, %v2625_v23, %v1948_v30  ;;  %vm4132_vm3 = vcmp.eq.f32.partialorder %v2218_v12, 8.507059e+37  ;;  %v2221_v49 = vor.u32 1.1754944e-38, %v2220_v5 }
 0x2e3   : > { %v2199_v35 = vadd.f32 %v2627_v54, %v2198_v42  ;;  %2638 = vpow2.f32 %v2117_v40  ;;  %v1954_v61 = vmul.f32 %v4107_v19, %v4081_v53  ;;  %v1851_v4 = vmul.f32 0.03125, %v1825_v36 }
 0x2e4   : > { %2640 = vrcp.f32 %v4111_v34  ;;  %v2040_v50 = vmul.f32 %v1952_v3, %v3925_v46  ;;  %v2232_v15 = vand.u32 2147483647, %v4111_v34  ;;  %vm1960_vm13 = vweird.f32 %v4107_v19 }
 0x2e5   : > { %v2203_v32 = vsel %vm2202_vm9, %v2627_v54, %v2199_v35  ;;  %v1955_v10 = vmul.f32 %v4107_v19, %v1954_v61  ;;  %v4136_v6 = vadd.f32 1e-05, %v1851_v4  ;;  %vm2228_vm0 = vweird.f32 %v4111_v34 }
 0x2e6   : > { %v2635_v47 = vpop.eup %2634  ;;  %v2208_v8 = vsel %vm4103_vm8, %v2207_v16, %v2203_v32  ;;  %v2060_v39 = vmul.f32 %v3981_v28, %v2040_v50  ;;  %v2234_v41 = vand.u32 2147483648, %v4111_v34  ;;  %vm4159_vm7 = vcmp.eq.f32.partialorder %v2232_v15, 8.507059e+37  ;;  %vm1961_vm8 = vmor %vm1959_vm15, %vm1960_vm13 }
 0x2e7   : > { %v4120_v14 = vpop.eup %2636  ;;  %v2380_v63 = vmul.f32 %v2208_v8, %v4021_v29  ;;  %v2210_v31 = vmul.f32 %v2635_v47, %v4088_v62  ;;  %v1956_v24 = vmul.f32 0.5, %v1955_v10  ;;  %vm2215_vm4 = vweird.f32 %v2635_v47 }
 0x2e8   : > { %v1964_v48 = vmul.f32 %v4120_v14, %v4097_v52  ;;  %2642 = vrsqrt.f32 %v4136_v6  ;;  %v4147_v51 = vadd.f32 %v3986_v55, %v2060_v39  ;;  %vm2216_vm6 = vmor %vm2214_vm1, %vm2215_vm4  ;;  %vm1970_vm9 = vweird.f32 %v4120_v14 }
 0x2e9   : > { %2396 = vst.msk [vmem:[%s4037_s16 + $0x18] sm:$0xff] %vm1696_vm11, %v2380_v63  ;;  %v2211_v7 = vsub.f32 1.0, %v2210_v31  ;;  %v2639_v23 = vpop.eup %2638  ;;  %v1957_v1 = vsub.f32 1.5, %v1956_v24  ;;  %v2235_v53 = vor.u32 1.1754944e-38, %v2234_v41  ;;  %vm1979_vm12 = vweird.f32 %v4136_v6  ;;  %vm1971_vm14 = vmor %vm1969_vm5, %vm1970_vm9 }
 0x2ea   : > { %v1828_v54 = vpop.xlane.xlu2 %1827  ;;  %v2641_v46 = vpop.eup %2640  ;;  %v4140_v0 = vadd.f32 1.0, %v2639_v23  ;;  %v1965_v44 = vmul.f32 %v4120_v14, %v1964_v48  ;;  %v2096_v42 = vsub.f32 0.0, %v4147_v51 }
 0x2eb   : > { %v2212_v56 = vmul.f32 %v2635_v47, %v2211_v7  ;;  %v2224_v21 = vmul.f32 %v2641_v46, %v4111_v34  ;;  %v1852_v13 = vmul.f32 0.03125, %v1828_v54  ;;  %v1958_v22 = vmul.f32 %v4107_v19, %v1957_v1 }
 0x2ec   : > { %2644 = vrcp.f32 %v4140_v0  ;;  %vm2229_vm2 = vweird.f32 %v2641_v46  ;;  %v1966_v59 = vmul.f32 0.5, %v1965_v44  ;;  %v2119_v16 = vmul.f32 1.442695, %v2096_v42 }
 0x2ed   : > { %v2213_v58 = vadd.f32 %v2635_v47, %v2212_v56  ;;  %v2225_v27 = vsub.f32 1.0, %v2224_v21  ;;  %v1962_v40 = vsel %vm1961_vm8, %v4107_v19, %v1958_v22  ;;  %v4169_v32 = vadd.f32 1e-05, %v1852_v13  ;;  %vm2230_vm10 = vmor %vm2228_vm0, %vm2229_vm2 }
 0x2ee   : > { %v2643_v26 = vpop.eup %2642  ;;  %v2041_v36 = vmul.f32 %v1962_v40, %v3931_v43  ;;  %v1967_v12 = vsub.f32 1.5, %v1966_v59  ;;  %2646 = vpow2.f32 %v2119_v16  ;;  %v2246_v4 = vand.u32 2147483647, %v4140_v0 }
 0x2ef   : > { %v2217_v2 = vsel %vm2216_vm6, %v2635_v47, %v2213_v58  ;;  %v2226_v35 = vmul.f32 %v2641_v46, %v2225_v27  ;;  %v1974_v61 = vmul.f32 %v2643_v26, %v4136_v6  ;;  %2648 = vrsqrt.f32 %v4169_v32 }
 0x2f0   : > { %v2222_v37 = vsel %vm4132_vm3, %v2221_v49, %v2217_v2  ;;  %v2061_v43 = vmul.f32 %v3981_v28, %v2041_v36  ;;  %v1968_v19 = vmul.f32 %v4120_v14, %v1967_v12  ;;  %v2248_v52 = vand.u32 2147483648, %v4140_v0 }
 0x2f1   : > { %v2381_v45 = vmul.f32 %v2222_v37, %v4051_v57  ;;  %v2227_v30 = vadd.f32 %v2641_v46, %v2226_v35  ;;  %v1975_v34 = vmul.f32 %v2643_v26, %v1974_v61  ;;  %vm1980_vm15 = vweird.f32 %v2643_v26 }
 0x2f2   : > { %v1831_v57 = vpop.xlane.xlu0 %1830  ;;  %v2645_v47 = vpop.eup %2644  ;;  %v4190_v31 = vadd.f32 %v3986_v55, %v2061_v43  ;;  %v1972_v3 = vsel %vm1971_vm14, %v4120_v14, %v1968_v19  ;;  %vm2242_vm3 = vweird.f32 %v4140_v0  ;;  %vm1981_vm4 = vmor %vm1979_vm12, %vm1980_vm15  ;;  %vm2247_vm13 = vcmp.eq.f32.partialorder %v2246_v4, 8.507059e+37 }
 0x2f3   : > { %2397 = vst.msk [vmem:[%s4037_s16 + $0x20] sm:$0xff] %vm1696_vm11, %v2381_v45  ;;  %v2231_v8 = vsel %vm2230_vm10, %v2641_v46, %v2227_v30  ;;  %v2238_v5 = vmul.f32 %v2645_v47, %v4140_v0  ;;  %v1853_v10 = vmul.f32 0.03125, %v1831_v57  ;;  %v2042_v48 = vmul.f32 %v1972_v3, %v3937_v33 }
 0x2f4   : > { %v2236_v63 = vsel %vm4159_vm7, %v2235_v53, %v2231_v8  ;;  %v1976_v29 = vmul.f32 0.5, %v1975_v34  ;;  %v2097_v49 = vsub.f32 0.0, %v4190_v31  ;;  %v2647_v23 = vpop.eup %2646  ;;  %vm2243_vm1 = vweird.f32 %v2645_v47 }
 0x2f5   : > { %v2382_v7 = vmul.f32 %v2236_v63, %v4072_v18  ;;  %v2239_v50 = vsub.f32 1.0, %v2238_v5  ;;  %v4197_v24 = vadd.f32 1e-05, %v1853_v10  ;;  %v2062_v14 = vmul.f32 %v3981_v28, %v2042_v48  ;;  %v2649_v18 = vpop.eup %2648  ;;  %vm2244_vm5 = vmor %vm2242_vm3, %vm2243_vm1 }
 0x2f6   : > { %v1977_v15 = vsub.f32 1.5, %v1976_v29  ;;  %v4203_v33 = vadd.f32 1.0, %v2647_v23  ;;  %v2121_v39 = vmul.f32 1.442695, %v2097_v49  ;;  %v1984_v44 = vmul.f32 %v2649_v18, %v4169_v32 }
 0x2f7   : > { %2398 = vst.msk [vmem:[%s4037_s16 + $0x28] sm:$0xff] %vm1696_vm11, %v2382_v7  ;;  %v2240_v56 = vmul.f32 %v2645_v47, %v2239_v50  ;;  %2650 = vrsqrt.f32 %v4197_v24  ;;  %v4207_v46 = vadd.f32 %v3986_v55, %v2062_v14  ;;  %v2249_v0 = vor.u32 1.1754944e-38, %v2248_v52 }
 0x2f8   : > { %v1978_v1 = vmul.f32 %v2643_v26, %v1977_v15  ;;  %2652 = vrcp.f32 %v4203_v33  ;;  %v1985_v22 = vmul.f32 %v2649_v18, %v1984_v44  ;;  %vm1989_vm6 = vweird.f32 %v4169_v32 }
 0x2f9   : > { %v2241_v54 = vadd.f32 %v2645_v47, %v2240_v56  ;;  %2654 = vpow2.f32 %v2121_v39  ;;  %v2098_v21 = vsub.f32 0.0, %v4207_v46  ;;  %vm1990_vm0 = vweird.f32 %v2649_v18 }
 0x2fa   : > { %v1982_v41 = vsel %vm1981_vm4, %v2643_v26, %v1978_v1  ;;  %v1834_v13 = vpop.xlane.xlu1 %1833  ;;  %v1986_v45 = vmul.f32 0.5, %v1985_v22  ;;  %v2260_v53 = vand.u32 2147483647, %v4203_v33  ;;  %v2262_v43 = vand.u32 2147483648, %v4203_v33  ;;  %vm1991_vm7 = vmor %vm1989_vm6, %vm1990_vm0 }
 0x2fb   : > { %v2245_v58 = vsel %vm2244_vm5, %v2645_v47, %v2241_v54  ;;  %v2043_v27 = vmul.f32 %v1982_v41, %v3943_v11  ;;  %v2123_v42 = vmul.f32 1.442695, %v2098_v21  ;;  %v1854_v59 = vmul.f32 0.03125, %v1834_v13 }
 0x2fc   : > { %v2250_v2 = vsel %vm2247_vm13, %v2249_v0, %v2245_v58  ;;  %v1987_v36 = vsub.f32 1.5, %v1986_v45  ;;  %vm2256_vm9 = vweird.f32 %v4203_v33  ;;  %vm1999_vm10 = vweird.f32 %v4197_v24 }
 0x2fd   : > { %v2383_v6 = vmul.f32 %v2250_v2, %v4091_v9  ;;  %v2651_v37 = vpop.eup %2650  ;;  %v2063_v62 = vmul.f32 %v3981_v28, %v2043_v27  ;;  %2656 = vpow2.f32 %v2123_v42  ;;  %v4225_v11 = vadd.f32 1e-05, %v1854_v59 }
 0x2fe   : > { %v1994_v35 = vmul.f32 %v2651_v37, %v4197_v24  ;;  %v2653_v16 = vpop.eup %2652  ;;  %v1988_v19 = vmul.f32 %v2649_v18, %v1987_v36  ;;  %vm2000_vm8 = vweird.f32 %v2651_v37  ;;  %vm2261_vm12 = vcmp.eq.f32.partialorder %v2260_v53, 8.507059e+37 }
 0x2ff   : > { %2399 = vst.msk [vmem:[%s4037_s16 + $0x30] sm:$0xff] %vm1696_vm11, %v2383_v6  ;;  %v4222_v40 = vadd.f32 %v3986_v55, %v2063_v62  ;;  %v2655_v9 = vpop.eup %2654  ;;  %v2252_v26 = vmul.f32 %v2653_v16, %v4203_v33  ;;  %2658 = vrsqrt.f32 %v4225_v11  ;;  %vm2257_vm2 = vweird.f32 %v2653_v16  ;;  %vm2001_vm14 = vmor %vm1999_vm10, %vm2000_vm8 }
 0x300   : > { %v1995_v12 = vmul.f32 %v2651_v37, %v1994_v35  ;;  %v4229_v61 = vadd.f32 1.0, %v2655_v9  ;;  %v1992_v3 = vsel %vm1991_vm7, %v2649_v18, %v1988_v19  ;;  %vm2258_vm15 = vmor %vm2256_vm9, %vm2257_vm2  ;;  %v2263_v52 = vor.u32 1.1754944e-38, %v2262_v43 }
 0x301   : > { %v2099_v57 = vsub.f32 0.0, %v4222_v40  ;;  %v2253_v47 = vsub.f32 1.0, %v2252_v26  ;;  %v2044_v50 = vmul.f32 %v1992_v3, %v3949_v60  ;;  %vm2009_vm1 = vweird.f32 %v4225_v11 }
 0x302   : > { %v1837_v30 = vpop.xlane.xlu2 %1836  ;;  %v1996_v8 = vmul.f32 0.5, %v1995_v12  ;;  %2660 = vrcp.f32 %v4229_v61  ;;  %v2274_v49 = vand.u32 2147483647, %v4229_v61  ;;  %v2276_v0 = vand.u32 2147483648, %v4229_v61 }
 0x303   : > { %v1855_v5 = vmul.f32 0.03125, %v1837_v30  ;;  %v2657_v4 = vpop.eup %2656  ;;  %v2254_v34 = vmul.f32 %v2653_v16, %v2253_v47  ;;  %v2125_v63 = vmul.f32 1.442695, %v2099_v57  ;;  %v2064_v24 = vmul.f32 %v3981_v28, %v2044_v50 }
 0x304   : > { %v1997_v10 = vsub.f32 1.5, %v1996_v8  ;;  %v4238_v7 = vadd.f32 1.0, %v2657_v4  ;;  %vm2270_vm3 = vweird.f32 %v4229_v61  ;;  %vm4267_vm4 = vcmp.eq.f32.partialorder %v2274_v49, 8.507059e+37 }
 0x305   : > { %v2255_v48 = vadd.f32 %v2653_v16, %v2254_v34  ;;  %2662 = vpow2.f32 %v2125_v63  ;;  %v4243_v29 = vpop.eup %2658  ;;  %v4248_v23 = vadd.f32 1e-05, %v1855_v5  ;;  %v4257_v1 = vadd.f32 %v3986_v55, %v2064_v24 }
 0x306   : > { %v1998_v32 = vmul.f32 %v2651_v37, %v1997_v10  ;;  %2664 = vrcp.f32 %v4238_v7  ;;  %v2004_v14 = vmul.f32 %v4243_v29, %v4225_v11  ;;  %v2277_v45 = vor.u32 1.1754944e-38, %v2276_v0 }
 0x307   : > { %v2259_v60 = vsel %vm2258_vm15, %v2653_v16, %v2255_v48  ;;  %2666 = vrsqrt.f32 %v4248_v23  ;;  %v2100_v13 = vsub.f32 0.0, %v4257_v1  ;;  %v2288_v35 = vand.u32 2147483647, %v4238_v7 }
 0x308   : > { %v2002_v56 = vsel %vm2001_vm14, %v2651_v37, %v1998_v32  ;;  %v2661_v15 = vpop.eup %2660  ;;  %v2264_v18 = vsel %vm2261_vm12, %v2263_v52, %v2259_v60  ;;  %v2005_v21 = vmul.f32 %v4243_v29, %v2004_v14  ;;  %v2290_v16 = vand.u32 2147483648, %v4238_v7 }
 0x309   : > { %v2045_v33 = vmul.f32 %v2002_v56, %v3955_v17  ;;  %v2384_v39 = vmul.f32 %v2264_v18, %v4147_v51  ;;  %v2266_v54 = vmul.f32 %v2661_v15, %v4229_v61  ;;  %vm2271_vm5 = vweird.f32 %v2661_v15 }
 0x30a   : > { %v1840_v44 = vpop.xlane.xlu0 %1839  ;;  %v2006_v42 = vmul.f32 0.5, %v2005_v21  ;;  %v2127_v59 = vmul.f32 1.442695, %v2100_v13  ;;  %vm2272_vm13 = vmor %vm2270_vm3, %vm2271_vm5  ;;  %vm2010_vm0 = vweird.f32 %v4243_v29  ;;  %vm2284_vm2 = vweird.f32 %v4238_v7 }
 0x30b   : > { %v2065_v58 = vmul.f32 %v3981_v28, %v2045_v33  ;;  %v2663_v41 = vpop.eup %2662  ;;  %2400 = vst.msk [vmem:[%s4037_s16 + $0x38] sm:$0xff] %vm1696_vm11, %v2384_v39  ;;  %v2267_v17 = vsub.f32 1.0, %v2266_v54  ;;  %v1856_v22 = vmul.f32 0.03125, %v1840_v44  ;;  %vm2011_vm7 = vmor %vm2009_vm1, %vm2010_vm0  ;;  %v2291_v3 = vor.u32 1.1754944e-38, %v2290_v16 }
 0x30c   : > { %v2665_v2 = vpop.eup %2664  ;;  %v4272_v27 = vadd.f32 1.0, %v2663_v41  ;;  %v2007_v30 = vsub.f32 1.5, %v2006_v42  ;;  %vm2289_vm9 = vcmp.eq.f32.partialorder %v2288_v35, 8.507059e+37  ;;  %vm2019_vm15 = vweird.f32 %v4248_v23 }
 0x30d   : > { %v4275_v6 = vadd.f32 %v3986_v55, %v2065_v58  ;;  %v2268_v37 = vmul.f32 %v2661_v15, %v2267_v17  ;;  %v2280_v62 = vmul.f32 %v2665_v2, %v4238_v7  ;;  %v4282_v12 = vpop.eup %2666  ;;  %vm2285_vm6 = vweird.f32 %v2665_v2 }
 0x30e   : > { %2668 = vrcp.f32 %v4272_v27  ;;  %v4287_v53 = vadd.f32 1e-05, %v1856_v22  ;;  %v2014_v19 = vmul.f32 %v4282_v12, %v4248_v23  ;;  %v2008_v61 = vmul.f32 %v4243_v29, %v2007_v30  ;;  %vm2286_vm8 = vmor %vm2284_vm2, %vm2285_vm6 }
 0x30f   : > { %v2269_v9 = vadd.f32 %v2661_v15, %v2268_v37  ;;  %v2281_v26 = vsub.f32 1.0, %v2280_v62  ;;  %2670 = vpow2.f32 %v2127_v59  ;;  %v2101_v36 = vsub.f32 0.0, %v4275_v6 }
 0x310   : > { %2672 = vrsqrt.f32 %v4287_v53  ;;  %v2015_v34 = vmul.f32 %v4282_v12, %v2014_v19  ;;  %v2012_v10 = vsel %vm2011_vm7, %v4243_v29, %v2008_v61  ;;  %v2302_v24 = vand.u32 2147483647, %v4272_v27 }
 0x311   : > { %v2273_v57 = vsel %vm2272_vm13, %v2661_v15, %v2269_v9  ;;  %v2282_v47 = vmul.f32 %v2665_v2, %v2281_v26  ;;  %v2129_v43 = vmul.f32 1.442695, %v2101_v36  ;;  %v2046_v48 = vmul.f32 %v2012_v10, %v3961_v25 }
 0x312   : > { %v2278_v8 = vsel %vm4267_vm4, %v2277_v45, %v2273_v57  ;;  %v2016_v52 = vmul.f32 0.5, %v2015_v34  ;;  %v2304_v14 = vand.u32 2147483648, %v4272_v27  ;;  %vm2020_vm12 = vweird.f32 %v4282_v12  ;;  %v2693_v34 = vld [vmem:[%s4385_s4] ss:$0 sm:$0xff] }
 0x313   : > { %v2385_v5 = vmul.f32 %v2278_v8, %v4190_v31  ;;  %v2283_v4 = vadd.f32 %v2665_v2, %v2282_v47  ;;  %2674 = vpow2.f32 %v2129_v43  ;;  %v2066_v29 = vmul.f32 %v3981_v28, %v2046_v48  ;;  %vm2021_vm1 = vmor %vm2019_vm15, %vm2020_vm12 }
 0x314   : > { %v2669_v63 = vpop.eup %2668  ;;  %vm2298_vm14 = vweird.f32 %v4272_v27  ;;  %vm2303_vm4 = vcmp.eq.f32.partialorder %v2302_v24, 8.507059e+37  ;;  %v2305_v21 = vor.u32 1.1754944e-38, %v2304_v14  ;;  %vm2029_vm13 = vweird.f32 %v4287_v53 }
 0x315   : > { %v2671_v7 = vpop.eup %2670  ;;  %2401 = vst.msk [vmem:[%s4037_s16 + $0x40] sm:$0xff] %vm1696_vm11, %v2385_v5  ;;  %v2287_v50 = vsel %vm2286_vm8, %v2665_v2, %v2283_v4  ;;  %v2294_v31 = vmul.f32 %v2669_v63, %v4272_v27  ;;  %vm2299_vm10 = vweird.f32 %v2669_v63  ;;  %v4317_v18 = vadd.f32 %v3986_v55, %v2066_v29 }
 0x316   : > { %v2292_v11 = vsel %vm2289_vm9, %v2291_v3, %v2287_v50  ;;  %v4306_v32 = vadd.f32 1.0, %v2671_v7  ;;  %v2673_v56 = vpop.eup %2672  ;;  %vm2300_vm3 = vmor %vm2298_vm14, %vm2299_vm10  ;;  %v2694_v50 = vld [vmem:[%s4386_s5] ss:$0 sm:$0xff] }
 0x317   : > { %v2386_v49 = vmul.f32 %v2292_v11, %v4207_v46  ;;  %v2295_v60 = vsub.f32 1.0, %v2294_v31  ;;  %v2017_v46 = vsub.f32 1.5, %v2016_v52  ;;  %v2024_v33 = vmul.f32 %v2673_v56, %v4287_v53 }
 0x318   : > { %2676 = vrcp.f32 %v4306_v32  ;;  %v2102_v44 = vsub.f32 0.0, %v4317_v18  ;;  %v2316_v37 = vand.u32 2147483647, %v4306_v32  ;;  %vm2030_vm5 = vweird.f32 %v2673_v56 }
 0x319   : > { %v2675_v25 = vpop.eup %2674  ;;  %2402 = vst.msk [vmem:[%s4037_s16 + $0x48] sm:$0xff] %vm1696_vm11, %v2386_v49  ;;  %v2296_v15 = vmul.f32 %v2669_v63, %v2295_v60  ;;  %v2018_v0 = vmul.f32 %v4282_v12, %v2017_v46  ;;  %v2025_v58 = vmul.f32 %v2673_v56, %v2024_v33  ;;  %v2318_v35 = vand.u32 2147483648, %v4306_v32  ;;  %vm2031_vm0 = vmor %vm2029_vm13, %vm2030_vm5 }
 0x31a   : > { %v4321_v39 = vadd.f32 1.0, %v2675_v25  ;;  %v2131_v17 = vmul.f32 1.442695, %v2102_v44  ;;  %vm2312_vm2 = vweird.f32 %v4306_v32  ;;  %vm4343_vm7 = vcmp.eq.f32.partialorder %v2316_v37, 8.507059e+37 }
 0x31b   : > { %v2297_v54 = vadd.f32 %v2669_v63, %v2296_v15  ;;  %v2022_v51 = vsel %vm2021_vm1, %v4282_v12, %v2018_v0  ;;  %v2026_v13 = vmul.f32 0.5, %v2025_v58  ;;  %v2319_v57 = vor.u32 1.1754944e-38, %v2318_v35 }
 0x31c   : > { %2678 = vrcp.f32 %v4321_v39  ;;  %v2047_v27 = vmul.f32 %v2022_v51, %v3967_v38  ;;  %v2330_v43 = vand.u32 2147483647, %v4321_v39  ;;  %v2332_v19 = vand.u32 2147483648, %v4321_v39 }
 0x31d   : > { %v2301_v41 = vsel %vm2300_vm3, %v2669_v63, %v2297_v54  ;;  %2680 = vpow2.f32 %v2131_v17  ;;  %v2027_v59 = vsub.f32 1.5, %v2026_v13  ;;  %vm2326_vm10 = vweird.f32 %v4321_v39 }
 0x31e   : > { %v2677_v23 = vpop.eup %2676  ;;  %v2306_v2 = vsel %vm2303_vm4, %v2305_v21, %v2301_v41  ;;  %v2067_v62 = vmul.f32 %v3981_v28, %v2047_v27  ;;  %v2333_v7 = vor.u32 1.1754944e-38, %v2332_v19  ;;  %vm2331_vm14 = vcmp.eq.f32.partialorder %v2330_v43, 8.507059e+37 }
 0x31f   : > { %v2387_v42 = vmul.f32 %v2306_v2, %v4222_v40  ;;  %v2308_v22 = vmul.f32 %v2677_v23, %v4306_v32  ;;  %v2028_v38 = vmul.f32 %v2673_v56, %v2027_v59  ;;  %vm2313_vm6 = vweird.f32 %v2677_v23 }
 0x320   : > { %v4338_v9 = vadd.f32 %v3986_v55, %v2067_v62  ;;  %vm2314_vm8 = vmor %vm2312_vm2, %vm2313_vm6 }
 0x321   : > { %2403 = vst.msk [vmem:[%s4037_s16 + $0x50] sm:$0xff] %vm1696_vm11, %v2387_v42  ;;  %v2309_v45 = vsub.f32 1.0, %v2308_v22  ;;  %v2032_v12 = vsel %vm2031_vm0, %v2673_v56, %v2028_v38 }
 0x322   : > { %v2679_v16 = vpop.eup %2678  ;;  %v2103_v36 = vsub.f32 0.0, %v4338_v9  ;;  %v2048_v53 = vmul.f32 %v2032_v12, %v3973_v20 }
 0x323   : > { %v2310_v40 = vmul.f32 %v2677_v23, %v2309_v45  ;;  %v2322_v26 = vmul.f32 %v2679_v16, %v4321_v39  ;;  %v2681_v30 = vpop.eup %2680  ;;  %vm2327_vm9 = vweird.f32 %v2679_v16 }
 0x324   : > { %v2150_v8 = vadd.f32 1.0, %v2681_v30  ;;  %v2133_v61 = vmul.f32 1.442695, %v2103_v36  ;;  %v2068_v63 = vmul.f32 %v2693_v34, %v2048_v53  ;;  %vm2328_vm12 = vmor %vm2326_vm10, %vm2327_vm9 }
 0x325   : > { %v2311_v55 = vadd.f32 %v2677_v23, %v2310_v40  ;;  %v2323_v47 = vsub.f32 1.0, %v2322_v26 }
 0x326   : > { %2682 = vrcp.f32 %v2150_v8  ;;  %v4361_v31 = vadd.f32 %v2694_v50, %v2068_v63  ;;  %v2346_v14 = vand.u32 2147483648, %v2150_v8  ;;  %v2344_v15 = vand.u32 2147483647, %v2150_v8 }
 0x327   : > { %v2315_v5 = vsel %vm2314_vm8, %v2677_v23, %v2311_v55  ;;  %v2324_v4 = vmul.f32 %v2679_v16, %v2323_v47  ;;  %2684 = vpow2.f32 %v2133_v61  ;;  %vm2340_vm1 = vweird.f32 %v2150_v8 }
 0x328   : > { %v2320_v3 = vsel %vm4343_vm7, %v2319_v57, %v2315_v5  ;;  %vm2345_vm4 = vcmp.eq.f32.partialorder %v2344_v15, 8.507059e+37 }
 0x329   : > { %v2388_v20 = vmul.f32 %v2320_v3, %v4257_v1  ;;  %v2325_v10 = vadd.f32 %v2679_v16, %v2324_v4  ;;  %v2104_v1 = vsub.f32 0.0, %v4361_v31 }
 0x32b   : > { %2404 = vst.msk [vmem:[%s4037_s16 + $0x58] sm:$0xff] %vm1696_vm11, %v2388_v20  ;;  %v2329_v48 = vsel %vm2328_vm12, %v2679_v16, %v2325_v10  ;;  %v2135_v49 = vmul.f32 1.442695, %v2104_v1 }
 0x32c   : > { %v2334_v11 = vsel %vm2331_vm14, %v2333_v7, %v2329_v48  ;;  %v2683_v52 = vpop.eup %2682 }
 0x32d   : > { %v2389_v32 = vmul.f32 %v2334_v11, %v4275_v6  ;;  %v2685_v60 = vpop.eup %2684  ;;  %v2336_v24 = vmul.f32 %v2683_v52, %v2150_v8  ;;  %2686 = vpow2.f32 %v2135_v49  ;;  %vm2341_vm15 = vweird.f32 %v2683_v52 }
 0x32e   : > { %v2151_v29 = vadd.f32 1.0, %v2685_v60  ;;  %vm2342_vm3 = vmor %vm2340_vm1, %vm2341_vm15  ;;  %v2347_v6 = vor.u32 1.1754944e-38, %v2346_v14 }
 0x32f   : > { %2405 = vst.msk [vmem:[%s4037_s16 + $0x60] sm:$0xff] %vm1696_vm11, %v2389_v32  ;;  %v2337_v56 = vsub.f32 1.0, %v2336_v24 }
 0x330   : > { %2688 = vrcp.f32 %v2151_v29  ;;  %v2360_v17 = vand.u32 2147483648, %v2151_v29  ;;  %v2358_v13 = vand.u32 2147483647, %v2151_v29  ;;  %vm2354_vm13 = vweird.f32 %v2151_v29 }
 0x331   : > { %v2338_v25 = vmul.f32 %v2683_v52, %v2337_v56 }
 0x332   : > { %v2361_v27 = vor.u32 1.1754944e-38, %v2360_v17  ;;  %vm2359_vm0 = vcmp.eq.f32.partialorder %v2358_v13, 8.507059e+37 }
 0x333   : > { %v2339_v46 = vadd.f32 %v2683_v52, %v2338_v25  ;;  %v2687_v33 = vpop.eup %2686 }
 0x334   : > { %v2152_v54 = vadd.f32 1.0, %v2687_v33 }
 0x335   : > { %v2343_v39 = vsel %vm2342_vm3, %v2683_v52, %v2339_v46 }
 0x336   : > { %v2689_v44 = vpop.eup %2688  ;;  %v2348_v0 = vsel %vm2345_vm4, %v2347_v6, %v2343_v39  ;;  %2690 = vrcp.f32 %v2152_v54  ;;  %v2374_v59 = vand.u32 2147483648, %v2152_v54  ;;  %v2372_v35 = vand.u32 2147483647, %v2152_v54 }
 0x337   : > { %v2390_v58 = vmul.f32 %v2348_v0, %v4317_v18  ;;  %v2350_v21 = vmul.f32 %v2689_v44, %v2151_v29  ;;  %vm2355_vm5 = vweird.f32 %v2689_v44  ;;  %vm2368_vm7 = vweird.f32 %v2152_v54 }
 0x338   : > { %vm2356_vm6 = vmor %vm2354_vm13, %vm2355_vm5  ;;  %v2375_v38 = vor.u32 1.1754944e-38, %v2374_v59  ;;  %vm2373_vm9 = vcmp.eq.f32.partialorder %v2372_v35, 8.507059e+37 }
 0x339   : > { %2406 = vst.msk [vmem:[%s4037_s16 + $0x68] sm:$0xff] %vm1696_vm11, %v2390_v58  ;;  %v2351_v41 = vsub.f32 1.0, %v2350_v21 }
 0x33b   : > { %v2352_v51 = vmul.f32 %v2689_v44, %v2351_v41 }
 0x33c   : > { %v2691_v23 = vpop.eup %2690 }
 0x33d   : > { %v2353_v2 = vadd.f32 %v2689_v44, %v2352_v51  ;;  %v2364_v42 = vmul.f32 %v2691_v23, %v2152_v54  ;;  %vm2369_vm2 = vweird.f32 %v2691_v23 }
 0x33e   : > { %vm2370_vm8 = vmor %vm2368_vm7, %vm2369_vm2 }
 0x33f   : > { %v2357_v22 = vsel %vm2356_vm6, %v2689_v44, %v2353_v2  ;;  %v2365_v18 = vsub.f32 1.0, %v2364_v42 }
 0x340   : > { %v2362_v37 = vsel %vm2359_vm0, %v2361_v27, %v2357_v22 }
 0x341   : > { %v2391_v62 = vmul.f32 %v2362_v37, %v4338_v9  ;;  %v2366_v45 = vmul.f32 %v2691_v23, %v2365_v18 }
 0x343   : > { %2407 = vst.msk [vmem:[%s4037_s16 + $0x70] sm:$0xff] %vm1696_vm11, %v2391_v62  ;;  %v2367_v16 = vadd.f32 %v2691_v23, %v2366_v45 }
 0x345   : > { %v2371_v40 = vsel %vm2370_vm8, %v2691_v23, %v2367_v16 }
 0x346   : > { %v2376_v26 = vsel %vm2373_vm9, %v2375_v38, %v2371_v40 }
 0x347   : > { %v2392_v28 = vmul.f32 %v2376_v26, %v4361_v31 }
 0x349   : > { %2408 = vst.msk [vmem:[%s4037_s16 + $0x78] sm:$0xff] %vm1696_vm11, %v2392_v28 }
 0x34a PF: > { %s17_s21 = sadd.s32 1, %s2720_s21  }
 0x34b   : > { %p14_p7 = scmp.ge.s32.totalorder %s17_s21, 4  }
 0x34d   :  { %16 = sbr.rel (!%p14_p7) target bundleno = 1 (0x1), region = 79 }
 0x352   :  { %2431 = vsyncpa [#allocation4], 1 }
 0x353   :  { %2433 = vsyncpa [#allocation4 + $0x1], 1 }

</bundles_post_ra>
